<compile_context>
chip_gen: v7x
topology: tpu7x:2x2x1
jax: 0.10.0
libtpu: 0.0.40
codegen_flags: <defaults>
</compile_context>

<pallas_src>
import math

import jax
import jax.numpy as jnp
from jax import lax
from jax.experimental import pallas as pl
from jax.experimental.pallas import tpu as pltpu

LANES = 128          # lane width of a vreg
MAX_TILE_ROWS = 1024 # (1024, 128) f32 block = 512 KiB -> fits all generations


def shallow_net_kernel(x_ref, w1_ref, b1_ref, w2_ref, b2_ref, o_ref):
    # x_ref / o_ref: (TILE_ROWS, 128) f32 in VMEM, batch elements on lanes.
    # w1_ref, b1_ref, w2_ref: (H,) f32 in SMEM;  b2_ref: (1,) f32 in SMEM.
    x = x_ref[...]                                  # (TILE_ROWS, 128)
    acc0 = jnp.zeros_like(x) + b2_ref[0]            # fold b2 into the accumulator

    def body(j, acc):
        h = jnp.tanh(x * w1_ref[j] + b1_ref[j])     # EUP tanh, VPU fma
        return acc + w2_ref[j] * h

    hidden = w1_ref.shape[0]
    acc = lax.fori_loop(0, hidden, body, acc0, unroll=True)
    o_ref[...] = acc


def shallow_network_forward(x, w1, b1, w2, b2):
    """x: (N, 1) f32; w1: (H, 1); b1: (H,); w2: (1, H); b2: (1,). Returns (N, 1)."""
    n = x.shape[0]
    hidden = w1.shape[0]

    # ---- lane-dense re-layout of the batch: (N, 1) -> (rows_padded, 128) ----
    rows = max(1, math.ceil(n / LANES))
    tile_rows = min(MAX_TILE_ROWS, ((rows + 7) // 8) * 8)   # multiple of 8 sublanes
    rows_padded = ((rows + tile_rows - 1) // tile_rows) * tile_rows
    total = rows_padded * LANES

    x_flat = jnp.pad(x.reshape(-1).astype(jnp.float32), (0, total - n))
    x2d = x_flat.reshape(rows_padded, LANES)

    # Flat f32 parameter vectors for SMEM scalar reads inside the kernel.
    w1_v = w1.reshape(hidden).astype(jnp.float32)
    b1_v = b1.reshape(hidden).astype(jnp.float32)
    w2_v = w2.reshape(hidden).astype(jnp.float32)
    b2_v = b2.reshape(1).astype(jnp.float32)

    grid = (rows_padded // tile_rows,)
    smem = pl.BlockSpec(memory_space=pltpu.MemorySpace.SMEM)
    stream = pl.BlockSpec((tile_rows, LANES), lambda i: (i, 0))

    cost = pl.CostEstimate(
        flops=4 * total * hidden,
        transcendentals=total * hidden,
        bytes_accessed=2 * total * 4 + (3 * hidden + 1) * 4,
    )

    y2d = pl.pallas_call(
        shallow_net_kernel,
        out_shape=jax.ShapeDtypeStruct((rows_padded, LANES), jnp.float32),
        grid=grid,
        in_specs=[stream, smem, smem, smem, smem],
        out_specs=stream,
        compiler_params=pltpu.CompilerParams(
            dimension_semantics=("parallel",),
        ),
        cost_estimate=cost,
    )(x2d, w1_v, b1_v, w2_v, b2_v)

    # Slice off the padded tail before returning the (N, 1) result.
    return y2d.reshape(-1)[:n].reshape(n, 1)


def init_params(key, hidden_size=50):
    """Deterministic init mimicking PyTorch nn.Linear default (U[-1/sqrt(fan_in), +])."""
    k1, k2, k3, k4 = jax.random.split(key, 4)
    bound1 = 1.0 / jnp.sqrt(1.0)                 # fan_in of Linear(1, H) is 1
    w1 = jax.random.uniform(k1, (hidden_size, 1), jnp.float32, -bound1, bound1)
    b1 = jax.random.uniform(k2, (hidden_size,), jnp.float32, -bound1, bound1)
    bound2 = 1.0 / jnp.sqrt(float(hidden_size))
    w2 = jax.random.uniform(k3, (1, hidden_size), jnp.float32, -bound2, bound2)
    b2 = jax.random.uniform(k4, (1,), jnp.float32, -bound2, bound2)
    return w1, b1, w2, b2


if __name__ == "__main__":
    key = jax.random.PRNGKey(0)
    k_params, k_x = jax.random.split(key)

    hidden_size = 50
    batch = 8
    w1, b1, w2, b2 = init_params(k_params, hidden_size)
    x = jax.random.normal(k_x, (batch, 1), dtype=jnp.float32)

    y = shallow_network_forward(x, w1, b1, w2, b2)
    y = jax.block_until_ready(y)

    # Pure-JAX reference check of the same forward pass.
    y_ref = jnp.tanh(x @ w1.T + b1) @ w2.T + b2
    assert y.shape == (batch, 1)
    assert jnp.allclose(y, y_ref, atol=1e-5, rtol=1e-5)

    print("KERNEL_OK")
</pallas_src>

<mosaic_0001>
module attributes {stable_mosaic.version = 11 : i64} {
  func.func @shallow_net_kernel(%arg0: i32, %arg1: memref<8x128xf32, #tpu.memory_space<vmem>>, %arg2: memref<50xf32, #tpu.memory_space<smem>>, %arg3: memref<50xf32, #tpu.memory_space<smem>>, %arg4: memref<50xf32, #tpu.memory_space<smem>>, %arg5: memref<1xf32, #tpu.memory_space<smem>>, %arg6: memref<8x128xf32, #tpu.memory_space<vmem>>) attributes {dimension_semantics = [#tpu.dimension_semantics<parallel>], iteration_bounds = array<i64: 1>, scalar_prefetch = 0 : i64, scratch_operands = 0 : i64, tpu.core_type = #tpu.core_type<tc>, window_params = [{transform_indices = @transform_0, window_bounds = array<i64: 8, 128>}, {transform_indices = @transform_1, window_bounds = array<i64: 50>}, {transform_indices = @transform_2, window_bounds = array<i64: 50>}, {transform_indices = @transform_3, window_bounds = array<i64: 50>}, {transform_indices = @transform_4, window_bounds = array<i64: 1>}, {transform_indices = @transform_5, window_bounds = array<i64: 8, 128>}]} {
    %c0 = arith.constant 0 : index
    %c0_0 = arith.constant 0 : index
    %0 = vector.load %arg1[%c0, %c0_0] : memref<8x128xf32, #tpu.memory_space<vmem>>, vector<8x128xf32>
    %cst = arith.constant 0.000000e+00 : f32
    %1 = vector.broadcast %cst : f32 to vector<8x128xf32>
    %c0_1 = arith.constant 0 : index
    %2 = memref.load %arg5[%c0_1] : memref<1xf32, #tpu.memory_space<smem>>
    %3 = vector.broadcast %2 : f32 to vector<8x128xf32>
    %4 = arith.addf %1, %3 : vector<8x128xf32>
    %c0_i32 = arith.constant 0 : i32
    %5 = arith.index_cast %c0_i32 : i32 to index
    %6 = memref.load %arg2[%5] : memref<50xf32, #tpu.memory_space<smem>>
    %7 = vector.broadcast %6 : f32 to vector<8x128xf32>
    %8 = arith.mulf %0, %7 : vector<8x128xf32>
    %9 = arith.index_cast %c0_i32 : i32 to index
    %10 = memref.load %arg3[%9] : memref<50xf32, #tpu.memory_space<smem>>
    %11 = vector.broadcast %10 : f32 to vector<8x128xf32>
    %12 = arith.addf %8, %11 : vector<8x128xf32>
    %13 = math.tanh %12 : vector<8x128xf32>
    %14 = arith.index_cast %c0_i32 : i32 to index
    %15 = memref.load %arg4[%14] : memref<50xf32, #tpu.memory_space<smem>>
    %16 = vector.broadcast %15 : f32 to vector<8x128xf32>
    %17 = arith.mulf %16, %13 : vector<8x128xf32>
    %18 = arith.addf %4, %17 : vector<8x128xf32>
    %c1_i32 = arith.constant 1 : i32
    %19 = arith.index_cast %c1_i32 : i32 to index
    %20 = memref.load %arg2[%19] : memref<50xf32, #tpu.memory_space<smem>>
    %21 = vector.broadcast %20 : f32 to vector<8x128xf32>
    %22 = arith.mulf %0, %21 : vector<8x128xf32>
    %23 = arith.index_cast %c1_i32 : i32 to index
    %24 = memref.load %arg3[%23] : memref<50xf32, #tpu.memory_space<smem>>
    %25 = vector.broadcast %24 : f32 to vector<8x128xf32>
    %26 = arith.addf %22, %25 : vector<8x128xf32>
    %27 = math.tanh %26 : vector<8x128xf32>
    %28 = arith.index_cast %c1_i32 : i32 to index
    %29 = memref.load %arg4[%28] : memref<50xf32, #tpu.memory_space<smem>>
    %30 = vector.broadcast %29 : f32 to vector<8x128xf32>
    %31 = arith.mulf %30, %27 : vector<8x128xf32>
    %32 = arith.addf %18, %31 : vector<8x128xf32>
    %c2_i32 = arith.constant 2 : i32
    %33 = arith.index_cast %c2_i32 : i32 to index
    %34 = memref.load %arg2[%33] : memref<50xf32, #tpu.memory_space<smem>>
    %35 = vector.broadcast %34 : f32 to vector<8x128xf32>
    %36 = arith.mulf %0, %35 : vector<8x128xf32>
    %37 = arith.index_cast %c2_i32 : i32 to index
    %38 = memref.load %arg3[%37] : memref<50xf32, #tpu.memory_space<smem>>
    %39 = vector.broadcast %38 : f32 to vector<8x128xf32>
    %40 = arith.addf %36, %39 : vector<8x128xf32>
    %41 = math.tanh %40 : vector<8x128xf32>
    %42 = arith.index_cast %c2_i32 : i32 to index
    %43 = memref.load %arg4[%42] : memref<50xf32, #tpu.memory_space<smem>>
    %44 = vector.broadcast %43 : f32 to vector<8x128xf32>
    %45 = arith.mulf %44, %41 : vector<8x128xf32>
    %46 = arith.addf %32, %45 : vector<8x128xf32>
    %c3_i32 = arith.constant 3 : i32
    %47 = arith.index_cast %c3_i32 : i32 to index
    %48 = memref.load %arg2[%47] : memref<50xf32, #tpu.memory_space<smem>>
    %49 = vector.broadcast %48 : f32 to vector<8x128xf32>
    %50 = arith.mulf %0, %49 : vector<8x128xf32>
    %51 = arith.index_cast %c3_i32 : i32 to index
    %52 = memref.load %arg3[%51] : memref<50xf32, #tpu.memory_space<smem>>
    %53 = vector.broadcast %52 : f32 to vector<8x128xf32>
    %54 = arith.addf %50, %53 : vector<8x128xf32>
    %55 = math.tanh %54 : vector<8x128xf32>
    %56 = arith.index_cast %c3_i32 : i32 to index
    %57 = memref.load %arg4[%56] : memref<50xf32, #tpu.memory_space<smem>>
    %58 = vector.broadcast %57 : f32 to vector<8x128xf32>
    %59 = arith.mulf %58, %55 : vector<8x128xf32>
    %60 = arith.addf %46, %59 : vector<8x128xf32>
    %c4_i32 = arith.constant 4 : i32
    %61 = arith.index_cast %c4_i32 : i32 to index
    %62 = memref.load %arg2[%61] : memref<50xf32, #tpu.memory_space<smem>>
    %63 = vector.broadcast %62 : f32 to vector<8x128xf32>
    %64 = arith.mulf %0, %63 : vector<8x128xf32>
    %65 = arith.index_cast %c4_i32 : i32 to index
    %66 = memref.load %arg3[%65] : memref<50xf32, #tpu.memory_space<smem>>
    %67 = vector.broadcast %66 : f32 to vector<8x128xf32>
    %68 = arith.addf %64, %67 : vector<8x128xf32>
    %69 = math.tanh %68 : vector<8x128xf32>
    %70 = arith.index_cast %c4_i32 : i32 to index
    %71 = memref.load %arg4[%70] : memref<50xf32, #tpu.memory_space<smem>>
    %72 = vector.broadcast %71 : f32 to vector<8x128xf32>
    %73 = arith.mulf %72, %69 : vector<8x128xf32>
    %74 = arith.addf %60, %73 : vector<8x128xf32>
    %c5_i32 = arith.constant 5 : i32
    %75 = arith.index_cast %c5_i32 : i32 to index
    %76 = memref.load %arg2[%75] : memref<50xf32, #tpu.memory_space<smem>>
    %77 = vector.broadcast %76 : f32 to vector<8x128xf32>
    %78 = arith.mulf %0, %77 : vector<8x128xf32>
    %79 = arith.index_cast %c5_i32 : i32 to index
    %80 = memref.load %arg3[%79] : memref<50xf32, #tpu.memory_space<smem>>
    %81 = vector.broadcast %80 : f32 to vector<8x128xf32>
    %82 = arith.addf %78, %81 : vector<8x128xf32>
    %83 = math.tanh %82 : vector<8x128xf32>
    %84 = arith.index_cast %c5_i32 : i32 to index
    %85 = memref.load %arg4[%84] : memref<50xf32, #tpu.memory_space<smem>>
    %86 = vector.broadcast %85 : f32 to vector<8x128xf32>
    %87 = arith.mulf %86, %83 : vector<8x128xf32>
    %88 = arith.addf %74, %87 : vector<8x128xf32>
    %c6_i32 = arith.constant 6 : i32
    %89 = arith.index_cast %c6_i32 : i32 to index
    %90 = memref.load %arg2[%89] : memref<50xf32, #tpu.memory_space<smem>>
    %91 = vector.broadcast %90 : f32 to vector<8x128xf32>
    %92 = arith.mulf %0, %91 : vector<8x128xf32>
    %93 = arith.index_cast %c6_i32 : i32 to index
    %94 = memref.load %arg3[%93] : memref<50xf32, #tpu.memory_space<smem>>
    %95 = vector.broadcast %94 : f32 to vector<8x128xf32>
    %96 = arith.addf %92, %95 : vector<8x128xf32>
    %97 = math.tanh %96 : vector<8x128xf32>
    %98 = arith.index_cast %c6_i32 : i32 to index
    %99 = memref.load %arg4[%98] : memref<50xf32, #tpu.memory_space<smem>>
    %100 = vector.broadcast %99 : f32 to vector<8x128xf32>
    %101 = arith.mulf %100, %97 : vector<8x128xf32>
    %102 = arith.addf %88, %101 : vector<8x128xf32>
    %c7_i32 = arith.constant 7 : i32
    %103 = arith.index_cast %c7_i32 : i32 to index
    %104 = memref.load %arg2[%103] : memref<50xf32, #tpu.memory_space<smem>>
    %105 = vector.broadcast %104 : f32 to vector<8x128xf32>
    %106 = arith.mulf %0, %105 : vector<8x128xf32>
    %107 = arith.index_cast %c7_i32 : i32 to index
    %108 = memref.load %arg3[%107] : memref<50xf32, #tpu.memory_space<smem>>
    %109 = vector.broadcast %108 : f32 to vector<8x128xf32>
    %110 = arith.addf %106, %109 : vector<8x128xf32>
    %111 = math.tanh %110 : vector<8x128xf32>
    %112 = arith.index_cast %c7_i32 : i32 to index
    %113 = memref.load %arg4[%112] : memref<50xf32, #tpu.memory_space<smem>>
    %114 = vector.broadcast %113 : f32 to vector<8x128xf32>
    %115 = arith.mulf %114, %111 : vector<8x128xf32>
    %116 = arith.addf %102, %115 : vector<8x128xf32>
    %c8_i32 = arith.constant 8 : i32
    %117 = arith.index_cast %c8_i32 : i32 to index
    %118 = memref.load %arg2[%117] : memref<50xf32, #tpu.memory_space<smem>>
    %119 = vector.broadcast %118 : f32 to vector<8x128xf32>
    %120 = arith.mulf %0, %119 : vector<8x128xf32>
    %121 = arith.index_cast %c8_i32 : i32 to index
    %122 = memref.load %arg3[%121] : memref<50xf32, #tpu.memory_space<smem>>
    %123 = vector.broadcast %122 : f32 to vector<8x128xf32>
    %124 = arith.addf %120, %123 : vector<8x128xf32>
    %125 = math.tanh %124 : vector<8x128xf32>
    %126 = arith.index_cast %c8_i32 : i32 to index
    %127 = memref.load %arg4[%126] : memref<50xf32, #tpu.memory_space<smem>>
    %128 = vector.broadcast %127 : f32 to vector<8x128xf32>
    %129 = arith.mulf %128, %125 : vector<8x128xf32>
    %130 = arith.addf %116, %129 : vector<8x128xf32>
    %c9_i32 = arith.constant 9 : i32
    %131 = arith.index_cast %c9_i32 : i32 to index
    %132 = memref.load %arg2[%131] : memref<50xf32, #tpu.memory_space<smem>>
    %133 = vector.broadcast %132 : f32 to vector<8x128xf32>
    %134 = arith.mulf %0, %133 : vector<8x128xf32>
    %135 = arith.index_cast %c9_i32 : i32 to index
    %136 = memref.load %arg3[%135] : memref<50xf32, #tpu.memory_space<smem>>
    %137 = vector.broadcast %136 : f32 to vector<8x128xf32>
    %138 = arith.addf %134, %137 : vector<8x128xf32>
    %139 = math.tanh %138 : vector<8x128xf32>
    %140 = arith.index_cast %c9_i32 : i32 to index
    %141 = memref.load %arg4[%140] : memref<50xf32, #tpu.memory_space<smem>>
    %142 = vector.broadcast %141 : f32 to vector<8x128xf32>
    %143 = arith.mulf %142, %139 : vector<8x128xf32>
    %144 = arith.addf %130, %143 : vector<8x128xf32>
    %c10_i32 = arith.constant 10 : i32
    %145 = arith.index_cast %c10_i32 : i32 to index
    %146 = memref.load %arg2[%145] : memref<50xf32, #tpu.memory_space<smem>>
    %147 = vector.broadcast %146 : f32 to vector<8x128xf32>
    %148 = arith.mulf %0, %147 : vector<8x128xf32>
    %149 = arith.index_cast %c10_i32 : i32 to index
    %150 = memref.load %arg3[%149] : memref<50xf32, #tpu.memory_space<smem>>
    %151 = vector.broadcast %150 : f32 to vector<8x128xf32>
    %152 = arith.addf %148, %151 : vector<8x128xf32>
    %153 = math.tanh %152 : vector<8x128xf32>
    %154 = arith.index_cast %c10_i32 : i32 to index
    %155 = memref.load %arg4[%154] : memref<50xf32, #tpu.memory_space<smem>>
    %156 = vector.broadcast %155 : f32 to vector<8x128xf32>
    %157 = arith.mulf %156, %153 : vector<8x128xf32>
    %158 = arith.addf %144, %157 : vector<8x128xf32>
    %c11_i32 = arith.constant 11 : i32
    %159 = arith.index_cast %c11_i32 : i32 to index
    %160 = memref.load %arg2[%159] : memref<50xf32, #tpu.memory_space<smem>>
    %161 = vector.broadcast %160 : f32 to vector<8x128xf32>
    %162 = arith.mulf %0, %161 : vector<8x128xf32>
    %163 = arith.index_cast %c11_i32 : i32 to index
    %164 = memref.load %arg3[%163] : memref<50xf32, #tpu.memory_space<smem>>
    %165 = vector.broadcast %164 : f32 to vector<8x128xf32>
    %166 = arith.addf %162, %165 : vector<8x128xf32>
    %167 = math.tanh %166 : vector<8x128xf32>
    %168 = arith.index_cast %c11_i32 : i32 to index
    %169 = memref.load %arg4[%168] : memref<50xf32, #tpu.memory_space<smem>>
    %170 = vector.broadcast %169 : f32 to vector<8x128xf32>
    %171 = arith.mulf %170, %167 : vector<8x128xf32>
    %172 = arith.addf %158, %171 : vector<8x128xf32>
    %c12_i32 = arith.constant 12 : i32
    %173 = arith.index_cast %c12_i32 : i32 to index
    %174 = memref.load %arg2[%173] : memref<50xf32, #tpu.memory_space<smem>>
    %175 = vector.broadcast %174 : f32 to vector<8x128xf32>
    %176 = arith.mulf %0, %175 : vector<8x128xf32>
    %177 = arith.index_cast %c12_i32 : i32 to index
    %178 = memref.load %arg3[%177] : memref<50xf32, #tpu.memory_space<smem>>
    %179 = vector.broadcast %178 : f32 to vector<8x128xf32>
    %180 = arith.addf %176, %179 : vector<8x128xf32>
    %181 = math.tanh %180 : vector<8x128xf32>
    %182 = arith.index_cast %c12_i32 : i32 to index
    %183 = memref.load %arg4[%182] : memref<50xf32, #tpu.memory_space<smem>>
    %184 = vector.broadcast %183 : f32 to vector<8x128xf32>
    %185 = arith.mulf %184, %181 : vector<8x128xf32>
    %186 = arith.addf %172, %185 : vector<8x128xf32>
    %c13_i32 = arith.constant 13 : i32
    %187 = arith.index_cast %c13_i32 : i32 to index
    %188 = memref.load %arg2[%187] : memref<50xf32, #tpu.memory_space<smem>>
    %189 = vector.broadcast %188 : f32 to vector<8x128xf32>
    %190 = arith.mulf %0, %189 : vector<8x128xf32>
    %191 = arith.index_cast %c13_i32 : i32 to index
    %192 = memref.load %arg3[%191] : memref<50xf32, #tpu.memory_space<smem>>
    %193 = vector.broadcast %192 : f32 to vector<8x128xf32>
    %194 = arith.addf %190, %193 : vector<8x128xf32>
    %195 = math.tanh %194 : vector<8x128xf32>
    %196 = arith.index_cast %c13_i32 : i32 to index
    %197 = memref.load %arg4[%196] : memref<50xf32, #tpu.memory_space<smem>>
    %198 = vector.broadcast %197 : f32 to vector<8x128xf32>
    %199 = arith.mulf %198, %195 : vector<8x128xf32>
    %200 = arith.addf %186, %199 : vector<8x128xf32>
    %c14_i32 = arith.constant 14 : i32
    %201 = arith.index_cast %c14_i32 : i32 to index
    %202 = memref.load %arg2[%201] : memref<50xf32, #tpu.memory_space<smem>>
    %203 = vector.broadcast %202 : f32 to vector<8x128xf32>
    %204 = arith.mulf %0, %203 : vector<8x128xf32>
    %205 = arith.index_cast %c14_i32 : i32 to index
    %206 = memref.load %arg3[%205] : memref<50xf32, #tpu.memory_space<smem>>
    %207 = vector.broadcast %206 : f32 to vector<8x128xf32>
    %208 = arith.addf %204, %207 : vector<8x128xf32>
    %209 = math.tanh %208 : vector<8x128xf32>
    %210 = arith.index_cast %c14_i32 : i32 to index
    %211 = memref.load %arg4[%210] : memref<50xf32, #tpu.memory_space<smem>>
    %212 = vector.broadcast %211 : f32 to vector<8x128xf32>
    %213 = arith.mulf %212, %209 : vector<8x128xf32>
    %214 = arith.addf %200, %213 : vector<8x128xf32>
    %c15_i32 = arith.constant 15 : i32
    %215 = arith.index_cast %c15_i32 : i32 to index
    %216 = memref.load %arg2[%215] : memref<50xf32, #tpu.memory_space<smem>>
    %217 = vector.broadcast %216 : f32 to vector<8x128xf32>
    %218 = arith.mulf %0, %217 : vector<8x128xf32>
    %219 = arith.index_cast %c15_i32 : i32 to index
    %220 = memref.load %arg3[%219] : memref<50xf32, #tpu.memory_space<smem>>
    %221 = vector.broadcast %220 : f32 to vector<8x128xf32>
    %222 = arith.addf %218, %221 : vector<8x128xf32>
    %223 = math.tanh %222 : vector<8x128xf32>
    %224 = arith.index_cast %c15_i32 : i32 to index
    %225 = memref.load %arg4[%224] : memref<50xf32, #tpu.memory_space<smem>>
    %226 = vector.broadcast %225 : f32 to vector<8x128xf32>
    %227 = arith.mulf %226, %223 : vector<8x128xf32>
    %228 = arith.addf %214, %227 : vector<8x128xf32>
    %c16_i32 = arith.constant 16 : i32
    %229 = arith.index_cast %c16_i32 : i32 to index
    %230 = memref.load %arg2[%229] : memref<50xf32, #tpu.memory_space<smem>>
    %231 = vector.broadcast %230 : f32 to vector<8x128xf32>
    %232 = arith.mulf %0, %231 : vector<8x128xf32>
    %233 = arith.index_cast %c16_i32 : i32 to index
    %234 = memref.load %arg3[%233] : memref<50xf32, #tpu.memory_space<smem>>
    %235 = vector.broadcast %234 : f32 to vector<8x128xf32>
    %236 = arith.addf %232, %235 : vector<8x128xf32>
    %237 = math.tanh %236 : vector<8x128xf32>
    %238 = arith.index_cast %c16_i32 : i32 to index
    %239 = memref.load %arg4[%238] : memref<50xf32, #tpu.memory_space<smem>>
    %240 = vector.broadcast %239 : f32 to vector<8x128xf32>
    %241 = arith.mulf %240, %237 : vector<8x128xf32>
    %242 = arith.addf %228, %241 : vector<8x128xf32>
    %c17_i32 = arith.constant 17 : i32
    %243 = arith.index_cast %c17_i32 : i32 to index
    %244 = memref.load %arg2[%243] : memref<50xf32, #tpu.memory_space<smem>>
    %245 = vector.broadcast %244 : f32 to vector<8x128xf32>
    %246 = arith.mulf %0, %245 : vector<8x128xf32>
    %247 = arith.index_cast %c17_i32 : i32 to index
    %248 = memref.load %arg3[%247] : memref<50xf32, #tpu.memory_space<smem>>
    %249 = vector.broadcast %248 : f32 to vector<8x128xf32>
    %250 = arith.addf %246, %249 : vector<8x128xf32>
    %251 = math.tanh %250 : vector<8x128xf32>
    %252 = arith.index_cast %c17_i32 : i32 to index
    %253 = memref.load %arg4[%252] : memref<50xf32, #tpu.memory_space<smem>>
    %254 = vector.broadcast %253 : f32 to vector<8x128xf32>
    %255 = arith.mulf %254, %251 : vector<8x128xf32>
    %256 = arith.addf %242, %255 : vector<8x128xf32>
    %c18_i32 = arith.constant 18 : i32
    %257 = arith.index_cast %c18_i32 : i32 to index
    %258 = memref.load %arg2[%257] : memref<50xf32, #tpu.memory_space<smem>>
    %259 = vector.broadcast %258 : f32 to vector<8x128xf32>
    %260 = arith.mulf %0, %259 : vector<8x128xf32>
    %261 = arith.index_cast %c18_i32 : i32 to index
    %262 = memref.load %arg3[%261] : memref<50xf32, #tpu.memory_space<smem>>
    %263 = vector.broadcast %262 : f32 to vector<8x128xf32>
    %264 = arith.addf %260, %263 : vector<8x128xf32>
    %265 = math.tanh %264 : vector<8x128xf32>
    %266 = arith.index_cast %c18_i32 : i32 to index
    %267 = memref.load %arg4[%266] : memref<50xf32, #tpu.memory_space<smem>>
    %268 = vector.broadcast %267 : f32 to vector<8x128xf32>
    %269 = arith.mulf %268, %265 : vector<8x128xf32>
    %270 = arith.addf %256, %269 : vector<8x128xf32>
    %c19_i32 = arith.constant 19 : i32
    %271 = arith.index_cast %c19_i32 : i32 to index
    %272 = memref.load %arg2[%271] : memref<50xf32, #tpu.memory_space<smem>>
    %273 = vector.broadcast %272 : f32 to vector<8x128xf32>
    %274 = arith.mulf %0, %273 : vector<8x128xf32>
    %275 = arith.index_cast %c19_i32 : i32 to index
    %276 = memref.load %arg3[%275] : memref<50xf32, #tpu.memory_space<smem>>
    %277 = vector.broadcast %276 : f32 to vector<8x128xf32>
    %278 = arith.addf %274, %277 : vector<8x128xf32>
    %279 = math.tanh %278 : vector<8x128xf32>
    %280 = arith.index_cast %c19_i32 : i32 to index
    %281 = memref.load %arg4[%280] : memref<50xf32, #tpu.memory_space<smem>>
    %282 = vector.broadcast %281 : f32 to vector<8x128xf32>
    %283 = arith.mulf %282, %279 : vector<8x128xf32>
    %284 = arith.addf %270, %283 : vector<8x128xf32>
    %c20_i32 = arith.constant 20 : i32
    %285 = arith.index_cast %c20_i32 : i32 to index
    %286 = memref.load %arg2[%285] : memref<50xf32, #tpu.memory_space<smem>>
    %287 = vector.broadcast %286 : f32 to vector<8x128xf32>
    %288 = arith.mulf %0, %287 : vector<8x128xf32>
    %289 = arith.index_cast %c20_i32 : i32 to index
    %290 = memref.load %arg3[%289] : memref<50xf32, #tpu.memory_space<smem>>
    %291 = vector.broadcast %290 : f32 to vector<8x128xf32>
    %292 = arith.addf %288, %291 : vector<8x128xf32>
    %293 = math.tanh %292 : vector<8x128xf32>
    %294 = arith.index_cast %c20_i32 : i32 to index
    %295 = memref.load %arg4[%294] : memref<50xf32, #tpu.memory_space<smem>>
    %296 = vector.broadcast %295 : f32 to vector<8x128xf32>
    %297 = arith.mulf %296, %293 : vector<8x128xf32>
    %298 = arith.addf %284, %297 : vector<8x128xf32>
    %c21_i32 = arith.constant 21 : i32
    %299 = arith.index_cast %c21_i32 : i32 to index
    %300 = memref.load %arg2[%299] : memref<50xf32, #tpu.memory_space<smem>>
    %301 = vector.broadcast %300 : f32 to vector<8x128xf32>
    %302 = arith.mulf %0, %301 : vector<8x128xf32>
    %303 = arith.index_cast %c21_i32 : i32 to index
    %304 = memref.load %arg3[%303] : memref<50xf32, #tpu.memory_space<smem>>
    %305 = vector.broadcast %304 : f32 to vector<8x128xf32>
    %306 = arith.addf %302, %305 : vector<8x128xf32>
    %307 = math.tanh %306 : vector<8x128xf32>
    %308 = arith.index_cast %c21_i32 : i32 to index
    %309 = memref.load %arg4[%308] : memref<50xf32, #tpu.memory_space<smem>>
    %310 = vector.broadcast %309 : f32 to vector<8x128xf32>
    %311 = arith.mulf %310, %307 : vector<8x128xf32>
    %312 = arith.addf %298, %311 : vector<8x128xf32>
    %c22_i32 = arith.constant 22 : i32
    %313 = arith.index_cast %c22_i32 : i32 to index
    %314 = memref.load %arg2[%313] : memref<50xf32, #tpu.memory_space<smem>>
    %315 = vector.broadcast %314 : f32 to vector<8x128xf32>
    %316 = arith.mulf %0, %315 : vector<8x128xf32>
    %317 = arith.index_cast %c22_i32 : i32 to index
    %318 = memref.load %arg3[%317] : memref<50xf32, #tpu.memory_space<smem>>
    %319 = vector.broadcast %318 : f32 to vector<8x128xf32>
    %320 = arith.addf %316, %319 : vector<8x128xf32>
    %321 = math.tanh %320 : vector<8x128xf32>
    %322 = arith.index_cast %c22_i32 : i32 to index
    %323 = memref.load %arg4[%322] : memref<50xf32, #tpu.memory_space<smem>>
    %324 = vector.broadcast %323 : f32 to vector<8x128xf32>
    %325 = arith.mulf %324, %321 : vector<8x128xf32>
    %326 = arith.addf %312, %325 : vector<8x128xf32>
    %c23_i32 = arith.constant 23 : i32
    %327 = arith.index_cast %c23_i32 : i32 to index
    %328 = memref.load %arg2[%327] : memref<50xf32, #tpu.memory_space<smem>>
    %329 = vector.broadcast %328 : f32 to vector<8x128xf32>
    %330 = arith.mulf %0, %329 : vector<8x128xf32>
    %331 = arith.index_cast %c23_i32 : i32 to index
    %332 = memref.load %arg3[%331] : memref<50xf32, #tpu.memory_space<smem>>
    %333 = vector.broadcast %332 : f32 to vector<8x128xf32>
    %334 = arith.addf %330, %333 : vector<8x128xf32>
    %335 = math.tanh %334 : vector<8x128xf32>
    %336 = arith.index_cast %c23_i32 : i32 to index
    %337 = memref.load %arg4[%336] : memref<50xf32, #tpu.memory_space<smem>>
    %338 = vector.broadcast %337 : f32 to vector<8x128xf32>
    %339 = arith.mulf %338, %335 : vector<8x128xf32>
    %340 = arith.addf %326, %339 : vector<8x128xf32>
    %c24_i32 = arith.constant 24 : i32
    %341 = arith.index_cast %c24_i32 : i32 to index
    %342 = memref.load %arg2[%341] : memref<50xf32, #tpu.memory_space<smem>>
    %343 = vector.broadcast %342 : f32 to vector<8x128xf32>
    %344 = arith.mulf %0, %343 : vector<8x128xf32>
    %345 = arith.index_cast %c24_i32 : i32 to index
    %346 = memref.load %arg3[%345] : memref<50xf32, #tpu.memory_space<smem>>
    %347 = vector.broadcast %346 : f32 to vector<8x128xf32>
    %348 = arith.addf %344, %347 : vector<8x128xf32>
    %349 = math.tanh %348 : vector<8x128xf32>
    %350 = arith.index_cast %c24_i32 : i32 to index
    %351 = memref.load %arg4[%350] : memref<50xf32, #tpu.memory_space<smem>>
    %352 = vector.broadcast %351 : f32 to vector<8x128xf32>
    %353 = arith.mulf %352, %349 : vector<8x128xf32>
    %354 = arith.addf %340, %353 : vector<8x128xf32>
    %c25_i32 = arith.constant 25 : i32
    %355 = arith.index_cast %c25_i32 : i32 to index
    %356 = memref.load %arg2[%355] : memref<50xf32, #tpu.memory_space<smem>>
    %357 = vector.broadcast %356 : f32 to vector<8x128xf32>
    %358 = arith.mulf %0, %357 : vector<8x128xf32>
    %359 = arith.index_cast %c25_i32 : i32 to index
    %360 = memref.load %arg3[%359] : memref<50xf32, #tpu.memory_space<smem>>
    %361 = vector.broadcast %360 : f32 to vector<8x128xf32>
    %362 = arith.addf %358, %361 : vector<8x128xf32>
    %363 = math.tanh %362 : vector<8x128xf32>
    %364 = arith.index_cast %c25_i32 : i32 to index
    %365 = memref.load %arg4[%364] : memref<50xf32, #tpu.memory_space<smem>>
    %366 = vector.broadcast %365 : f32 to vector<8x128xf32>
    %367 = arith.mulf %366, %363 : vector<8x128xf32>
    %368 = arith.addf %354, %367 : vector<8x128xf32>
    %c26_i32 = arith.constant 26 : i32
    %369 = arith.index_cast %c26_i32 : i32 to index
    %370 = memref.load %arg2[%369] : memref<50xf32, #tpu.memory_space<smem>>
    %371 = vector.broadcast %370 : f32 to vector<8x128xf32>
    %372 = arith.mulf %0, %371 : vector<8x128xf32>
    %373 = arith.index_cast %c26_i32 : i32 to index
    %374 = memref.load %arg3[%373] : memref<50xf32, #tpu.memory_space<smem>>
    %375 = vector.broadcast %374 : f32 to vector<8x128xf32>
    %376 = arith.addf %372, %375 : vector<8x128xf32>
    %377 = math.tanh %376 : vector<8x128xf32>
    %378 = arith.index_cast %c26_i32 : i32 to index
    %379 = memref.load %arg4[%378] : memref<50xf32, #tpu.memory_space<smem>>
    %380 = vector.broadcast %379 : f32 to vector<8x128xf32>
    %381 = arith.mulf %380, %377 : vector<8x128xf32>
    %382 = arith.addf %368, %381 : vector<8x128xf32>
    %c27_i32 = arith.constant 27 : i32
    %383 = arith.index_cast %c27_i32 : i32 to index
    %384 = memref.load %arg2[%383] : memref<50xf32, #tpu.memory_space<smem>>
    %385 = vector.broadcast %384 : f32 to vector<8x128xf32>
    %386 = arith.mulf %0, %385 : vector<8x128xf32>
    %387 = arith.index_cast %c27_i32 : i32 to index
    %388 = memref.load %arg3[%387] : memref<50xf32, #tpu.memory_space<smem>>
    %389 = vector.broadcast %388 : f32 to vector<8x128xf32>
    %390 = arith.addf %386, %389 : vector<8x128xf32>
    %391 = math.tanh %390 : vector<8x128xf32>
    %392 = arith.index_cast %c27_i32 : i32 to index
    %393 = memref.load %arg4[%392] : memref<50xf32, #tpu.memory_space<smem>>
    %394 = vector.broadcast %393 : f32 to vector<8x128xf32>
    %395 = arith.mulf %394, %391 : vector<8x128xf32>
    %396 = arith.addf %382, %395 : vector<8x128xf32>
    %c28_i32 = arith.constant 28 : i32
    %397 = arith.index_cast %c28_i32 : i32 to index
    %398 = memref.load %arg2[%397] : memref<50xf32, #tpu.memory_space<smem>>
    %399 = vector.broadcast %398 : f32 to vector<8x128xf32>
    %400 = arith.mulf %0, %399 : vector<8x128xf32>
    %401 = arith.index_cast %c28_i32 : i32 to index
    %402 = memref.load %arg3[%401] : memref<50xf32, #tpu.memory_space<smem>>
    %403 = vector.broadcast %402 : f32 to vector<8x128xf32>
    %404 = arith.addf %400, %403 : vector<8x128xf32>
    %405 = math.tanh %404 : vector<8x128xf32>
    %406 = arith.index_cast %c28_i32 : i32 to index
    %407 = memref.load %arg4[%406] : memref<50xf32, #tpu.memory_space<smem>>
    %408 = vector.broadcast %407 : f32 to vector<8x128xf32>
    %409 = arith.mulf %408, %405 : vector<8x128xf32>
    %410 = arith.addf %396, %409 : vector<8x128xf32>
    %c29_i32 = arith.constant 29 : i32
    %411 = arith.index_cast %c29_i32 : i32 to index
    %412 = memref.load %arg2[%411] : memref<50xf32, #tpu.memory_space<smem>>
    %413 = vector.broadcast %412 : f32 to vector<8x128xf32>
    %414 = arith.mulf %0, %413 : vector<8x128xf32>
    %415 = arith.index_cast %c29_i32 : i32 to index
    %416 = memref.load %arg3[%415] : memref<50xf32, #tpu.memory_space<smem>>
    %417 = vector.broadcast %416 : f32 to vector<8x128xf32>
    %418 = arith.addf %414, %417 : vector<8x128xf32>
    %419 = math.tanh %418 : vector<8x128xf32>
    %420 = arith.index_cast %c29_i32 : i32 to index
    %421 = memref.load %arg4[%420] : memref<50xf32, #tpu.memory_space<smem>>
    %422 = vector.broadcast %421 : f32 to vector<8x128xf32>
    %423 = arith.mulf %422, %419 : vector<8x128xf32>
    %424 = arith.addf %410, %423 : vector<8x128xf32>
    %c30_i32 = arith.constant 30 : i32
    %425 = arith.index_cast %c30_i32 : i32 to index
    %426 = memref.load %arg2[%425] : memref<50xf32, #tpu.memory_space<smem>>
    %427 = vector.broadcast %426 : f32 to vector<8x128xf32>
    %428 = arith.mulf %0, %427 : vector<8x128xf32>
    %429 = arith.index_cast %c30_i32 : i32 to index
    %430 = memref.load %arg3[%429] : memref<50xf32, #tpu.memory_space<smem>>
    %431 = vector.broadcast %430 : f32 to vector<8x128xf32>
    %432 = arith.addf %428, %431 : vector<8x128xf32>
    %433 = math.tanh %432 : vector<8x128xf32>
    %434 = arith.index_cast %c30_i32 : i32 to index
    %435 = memref.load %arg4[%434] : memref<50xf32, #tpu.memory_space<smem>>
    %436 = vector.broadcast %435 : f32 to vector<8x128xf32>
    %437 = arith.mulf %436, %433 : vector<8x128xf32>
    %438 = arith.addf %424, %437 : vector<8x128xf32>
    %c31_i32 = arith.constant 31 : i32
    %439 = arith.index_cast %c31_i32 : i32 to index
    %440 = memref.load %arg2[%439] : memref<50xf32, #tpu.memory_space<smem>>
    %441 = vector.broadcast %440 : f32 to vector<8x128xf32>
    %442 = arith.mulf %0, %441 : vector<8x128xf32>
    %443 = arith.index_cast %c31_i32 : i32 to index
    %444 = memref.load %arg3[%443] : memref<50xf32, #tpu.memory_space<smem>>
    %445 = vector.broadcast %444 : f32 to vector<8x128xf32>
    %446 = arith.addf %442, %445 : vector<8x128xf32>
    %447 = math.tanh %446 : vector<8x128xf32>
    %448 = arith.index_cast %c31_i32 : i32 to index
    %449 = memref.load %arg4[%448] : memref<50xf32, #tpu.memory_space<smem>>
    %450 = vector.broadcast %449 : f32 to vector<8x128xf32>
    %451 = arith.mulf %450, %447 : vector<8x128xf32>
    %452 = arith.addf %438, %451 : vector<8x128xf32>
    %c32_i32 = arith.constant 32 : i32
    %453 = arith.index_cast %c32_i32 : i32 to index
    %454 = memref.load %arg2[%453] : memref<50xf32, #tpu.memory_space<smem>>
    %455 = vector.broadcast %454 : f32 to vector<8x128xf32>
    %456 = arith.mulf %0, %455 : vector<8x128xf32>
    %457 = arith.index_cast %c32_i32 : i32 to index
    %458 = memref.load %arg3[%457] : memref<50xf32, #tpu.memory_space<smem>>
    %459 = vector.broadcast %458 : f32 to vector<8x128xf32>
    %460 = arith.addf %456, %459 : vector<8x128xf32>
    %461 = math.tanh %460 : vector<8x128xf32>
    %462 = arith.index_cast %c32_i32 : i32 to index
    %463 = memref.load %arg4[%462] : memref<50xf32, #tpu.memory_space<smem>>
    %464 = vector.broadcast %463 : f32 to vector<8x128xf32>
    %465 = arith.mulf %464, %461 : vector<8x128xf32>
    %466 = arith.addf %452, %465 : vector<8x128xf32>
    %c33_i32 = arith.constant 33 : i32
    %467 = arith.index_cast %c33_i32 : i32 to index
    %468 = memref.load %arg2[%467] : memref<50xf32, #tpu.memory_space<smem>>
    %469 = vector.broadcast %468 : f32 to vector<8x128xf32>
    %470 = arith.mulf %0, %469 : vector<8x128xf32>
    %471 = arith.index_cast %c33_i32 : i32 to index
    %472 = memref.load %arg3[%471] : memref<50xf32, #tpu.memory_space<smem>>
    %473 = vector.broadcast %472 : f32 to vector<8x128xf32>
    %474 = arith.addf %470, %473 : vector<8x128xf32>
    %475 = math.tanh %474 : vector<8x128xf32>
    %476 = arith.index_cast %c33_i32 : i32 to index
    %477 = memref.load %arg4[%476] : memref<50xf32, #tpu.memory_space<smem>>
    %478 = vector.broadcast %477 : f32 to vector<8x128xf32>
    %479 = arith.mulf %478, %475 : vector<8x128xf32>
    %480 = arith.addf %466, %479 : vector<8x128xf32>
    %c34_i32 = arith.constant 34 : i32
    %481 = arith.index_cast %c34_i32 : i32 to index
    %482 = memref.load %arg2[%481] : memref<50xf32, #tpu.memory_space<smem>>
    %483 = vector.broadcast %482 : f32 to vector<8x128xf32>
    %484 = arith.mulf %0, %483 : vector<8x128xf32>
    %485 = arith.index_cast %c34_i32 : i32 to index
    %486 = memref.load %arg3[%485] : memref<50xf32, #tpu.memory_space<smem>>
    %487 = vector.broadcast %486 : f32 to vector<8x128xf32>
    %488 = arith.addf %484, %487 : vector<8x128xf32>
    %489 = math.tanh %488 : vector<8x128xf32>
    %490 = arith.index_cast %c34_i32 : i32 to index
    %491 = memref.load %arg4[%490] : memref<50xf32, #tpu.memory_space<smem>>
    %492 = vector.broadcast %491 : f32 to vector<8x128xf32>
    %493 = arith.mulf %492, %489 : vector<8x128xf32>
    %494 = arith.addf %480, %493 : vector<8x128xf32>
    %c35_i32 = arith.constant 35 : i32
    %495 = arith.index_cast %c35_i32 : i32 to index
    %496 = memref.load %arg2[%495] : memref<50xf32, #tpu.memory_space<smem>>
    %497 = vector.broadcast %496 : f32 to vector<8x128xf32>
    %498 = arith.mulf %0, %497 : vector<8x128xf32>
    %499 = arith.index_cast %c35_i32 : i32 to index
    %500 = memref.load %arg3[%499] : memref<50xf32, #tpu.memory_space<smem>>
    %501 = vector.broadcast %500 : f32 to vector<8x128xf32>
    %502 = arith.addf %498, %501 : vector<8x128xf32>
    %503 = math.tanh %502 : vector<8x128xf32>
    %504 = arith.index_cast %c35_i32 : i32 to index
    %505 = memref.load %arg4[%504] : memref<50xf32, #tpu.memory_space<smem>>
    %506 = vector.broadcast %505 : f32 to vector<8x128xf32>
    %507 = arith.mulf %506, %503 : vector<8x128xf32>
    %508 = arith.addf %494, %507 : vector<8x128xf32>
    %c36_i32 = arith.constant 36 : i32
    %509 = arith.index_cast %c36_i32 : i32 to index
    %510 = memref.load %arg2[%509] : memref<50xf32, #tpu.memory_space<smem>>
    %511 = vector.broadcast %510 : f32 to vector<8x128xf32>
    %512 = arith.mulf %0, %511 : vector<8x128xf32>
    %513 = arith.index_cast %c36_i32 : i32 to index
    %514 = memref.load %arg3[%513] : memref<50xf32, #tpu.memory_space<smem>>
    %515 = vector.broadcast %514 : f32 to vector<8x128xf32>
    %516 = arith.addf %512, %515 : vector<8x128xf32>
    %517 = math.tanh %516 : vector<8x128xf32>
    %518 = arith.index_cast %c36_i32 : i32 to index
    %519 = memref.load %arg4[%518] : memref<50xf32, #tpu.memory_space<smem>>
    %520 = vector.broadcast %519 : f32 to vector<8x128xf32>
    %521 = arith.mulf %520, %517 : vector<8x128xf32>
    %522 = arith.addf %508, %521 : vector<8x128xf32>
    %c37_i32 = arith.constant 37 : i32
    %523 = arith.index_cast %c37_i32 : i32 to index
    %524 = memref.load %arg2[%523] : memref<50xf32, #tpu.memory_space<smem>>
    %525 = vector.broadcast %524 : f32 to vector<8x128xf32>
    %526 = arith.mulf %0, %525 : vector<8x128xf32>
    %527 = arith.index_cast %c37_i32 : i32 to index
    %528 = memref.load %arg3[%527] : memref<50xf32, #tpu.memory_space<smem>>
    %529 = vector.broadcast %528 : f32 to vector<8x128xf32>
    %530 = arith.addf %526, %529 : vector<8x128xf32>
    %531 = math.tanh %530 : vector<8x128xf32>
    %532 = arith.index_cast %c37_i32 : i32 to index
    %533 = memref.load %arg4[%532] : memref<50xf32, #tpu.memory_space<smem>>
    %534 = vector.broadcast %533 : f32 to vector<8x128xf32>
    %535 = arith.mulf %534, %531 : vector<8x128xf32>
    %536 = arith.addf %522, %535 : vector<8x128xf32>
    %c38_i32 = arith.constant 38 : i32
    %537 = arith.index_cast %c38_i32 : i32 to index
    %538 = memref.load %arg2[%537] : memref<50xf32, #tpu.memory_space<smem>>
    %539 = vector.broadcast %538 : f32 to vector<8x128xf32>
    %540 = arith.mulf %0, %539 : vector<8x128xf32>
    %541 = arith.index_cast %c38_i32 : i32 to index
    %542 = memref.load %arg3[%541] : memref<50xf32, #tpu.memory_space<smem>>
    %543 = vector.broadcast %542 : f32 to vector<8x128xf32>
    %544 = arith.addf %540, %543 : vector<8x128xf32>
    %545 = math.tanh %544 : vector<8x128xf32>
    %546 = arith.index_cast %c38_i32 : i32 to index
    %547 = memref.load %arg4[%546] : memref<50xf32, #tpu.memory_space<smem>>
    %548 = vector.broadcast %547 : f32 to vector<8x128xf32>
    %549 = arith.mulf %548, %545 : vector<8x128xf32>
    %550 = arith.addf %536, %549 : vector<8x128xf32>
    %c39_i32 = arith.constant 39 : i32
    %551 = arith.index_cast %c39_i32 : i32 to index
    %552 = memref.load %arg2[%551] : memref<50xf32, #tpu.memory_space<smem>>
    %553 = vector.broadcast %552 : f32 to vector<8x128xf32>
    %554 = arith.mulf %0, %553 : vector<8x128xf32>
    %555 = arith.index_cast %c39_i32 : i32 to index
    %556 = memref.load %arg3[%555] : memref<50xf32, #tpu.memory_space<smem>>
    %557 = vector.broadcast %556 : f32 to vector<8x128xf32>
    %558 = arith.addf %554, %557 : vector<8x128xf32>
    %559 = math.tanh %558 : vector<8x128xf32>
    %560 = arith.index_cast %c39_i32 : i32 to index
    %561 = memref.load %arg4[%560] : memref<50xf32, #tpu.memory_space<smem>>
    %562 = vector.broadcast %561 : f32 to vector<8x128xf32>
    %563 = arith.mulf %562, %559 : vector<8x128xf32>
    %564 = arith.addf %550, %563 : vector<8x128xf32>
    %c40_i32 = arith.constant 40 : i32
    %565 = arith.index_cast %c40_i32 : i32 to index
    %566 = memref.load %arg2[%565] : memref<50xf32, #tpu.memory_space<smem>>
    %567 = vector.broadcast %566 : f32 to vector<8x128xf32>
    %568 = arith.mulf %0, %567 : vector<8x128xf32>
    %569 = arith.index_cast %c40_i32 : i32 to index
    %570 = memref.load %arg3[%569] : memref<50xf32, #tpu.memory_space<smem>>
    %571 = vector.broadcast %570 : f32 to vector<8x128xf32>
    %572 = arith.addf %568, %571 : vector<8x128xf32>
    %573 = math.tanh %572 : vector<8x128xf32>
    %574 = arith.index_cast %c40_i32 : i32 to index
    %575 = memref.load %arg4[%574] : memref<50xf32, #tpu.memory_space<smem>>
    %576 = vector.broadcast %575 : f32 to vector<8x128xf32>
    %577 = arith.mulf %576, %573 : vector<8x128xf32>
    %578 = arith.addf %564, %577 : vector<8x128xf32>
    %c41_i32 = arith.constant 41 : i32
    %579 = arith.index_cast %c41_i32 : i32 to index
    %580 = memref.load %arg2[%579] : memref<50xf32, #tpu.memory_space<smem>>
    %581 = vector.broadcast %580 : f32 to vector<8x128xf32>
    %582 = arith.mulf %0, %581 : vector<8x128xf32>
    %583 = arith.index_cast %c41_i32 : i32 to index
    %584 = memref.load %arg3[%583] : memref<50xf32, #tpu.memory_space<smem>>
    %585 = vector.broadcast %584 : f32 to vector<8x128xf32>
    %586 = arith.addf %582, %585 : vector<8x128xf32>
    %587 = math.tanh %586 : vector<8x128xf32>
    %588 = arith.index_cast %c41_i32 : i32 to index
    %589 = memref.load %arg4[%588] : memref<50xf32, #tpu.memory_space<smem>>
    %590 = vector.broadcast %589 : f32 to vector<8x128xf32>
    %591 = arith.mulf %590, %587 : vector<8x128xf32>
    %592 = arith.addf %578, %591 : vector<8x128xf32>
    %c42_i32 = arith.constant 42 : i32
    %593 = arith.index_cast %c42_i32 : i32 to index
    %594 = memref.load %arg2[%593] : memref<50xf32, #tpu.memory_space<smem>>
    %595 = vector.broadcast %594 : f32 to vector<8x128xf32>
    %596 = arith.mulf %0, %595 : vector<8x128xf32>
    %597 = arith.index_cast %c42_i32 : i32 to index
    %598 = memref.load %arg3[%597] : memref<50xf32, #tpu.memory_space<smem>>
    %599 = vector.broadcast %598 : f32 to vector<8x128xf32>
    %600 = arith.addf %596, %599 : vector<8x128xf32>
    %601 = math.tanh %600 : vector<8x128xf32>
    %602 = arith.index_cast %c42_i32 : i32 to index
    %603 = memref.load %arg4[%602] : memref<50xf32, #tpu.memory_space<smem>>
    %604 = vector.broadcast %603 : f32 to vector<8x128xf32>
    %605 = arith.mulf %604, %601 : vector<8x128xf32>
    %606 = arith.addf %592, %605 : vector<8x128xf32>
    %c43_i32 = arith.constant 43 : i32
    %607 = arith.index_cast %c43_i32 : i32 to index
    %608 = memref.load %arg2[%607] : memref<50xf32, #tpu.memory_space<smem>>
    %609 = vector.broadcast %608 : f32 to vector<8x128xf32>
    %610 = arith.mulf %0, %609 : vector<8x128xf32>
    %611 = arith.index_cast %c43_i32 : i32 to index
    %612 = memref.load %arg3[%611] : memref<50xf32, #tpu.memory_space<smem>>
    %613 = vector.broadcast %612 : f32 to vector<8x128xf32>
    %614 = arith.addf %610, %613 : vector<8x128xf32>
    %615 = math.tanh %614 : vector<8x128xf32>
    %616 = arith.index_cast %c43_i32 : i32 to index
    %617 = memref.load %arg4[%616] : memref<50xf32, #tpu.memory_space<smem>>
    %618 = vector.broadcast %617 : f32 to vector<8x128xf32>
    %619 = arith.mulf %618, %615 : vector<8x128xf32>
    %620 = arith.addf %606, %619 : vector<8x128xf32>
    %c44_i32 = arith.constant 44 : i32
    %621 = arith.index_cast %c44_i32 : i32 to index
    %622 = memref.load %arg2[%621] : memref<50xf32, #tpu.memory_space<smem>>
    %623 = vector.broadcast %622 : f32 to vector<8x128xf32>
    %624 = arith.mulf %0, %623 : vector<8x128xf32>
    %625 = arith.index_cast %c44_i32 : i32 to index
    %626 = memref.load %arg3[%625] : memref<50xf32, #tpu.memory_space<smem>>
    %627 = vector.broadcast %626 : f32 to vector<8x128xf32>
    %628 = arith.addf %624, %627 : vector<8x128xf32>
    %629 = math.tanh %628 : vector<8x128xf32>
    %630 = arith.index_cast %c44_i32 : i32 to index
    %631 = memref.load %arg4[%630] : memref<50xf32, #tpu.memory_space<smem>>
    %632 = vector.broadcast %631 : f32 to vector<8x128xf32>
    %633 = arith.mulf %632, %629 : vector<8x128xf32>
    %634 = arith.addf %620, %633 : vector<8x128xf32>
    %c45_i32 = arith.constant 45 : i32
    %635 = arith.index_cast %c45_i32 : i32 to index
    %636 = memref.load %arg2[%635] : memref<50xf32, #tpu.memory_space<smem>>
    %637 = vector.broadcast %636 : f32 to vector<8x128xf32>
    %638 = arith.mulf %0, %637 : vector<8x128xf32>
    %639 = arith.index_cast %c45_i32 : i32 to index
    %640 = memref.load %arg3[%639] : memref<50xf32, #tpu.memory_space<smem>>
    %641 = vector.broadcast %640 : f32 to vector<8x128xf32>
    %642 = arith.addf %638, %641 : vector<8x128xf32>
    %643 = math.tanh %642 : vector<8x128xf32>
    %644 = arith.index_cast %c45_i32 : i32 to index
    %645 = memref.load %arg4[%644] : memref<50xf32, #tpu.memory_space<smem>>
    %646 = vector.broadcast %645 : f32 to vector<8x128xf32>
    %647 = arith.mulf %646, %643 : vector<8x128xf32>
    %648 = arith.addf %634, %647 : vector<8x128xf32>
    %c46_i32 = arith.constant 46 : i32
    %649 = arith.index_cast %c46_i32 : i32 to index
    %650 = memref.load %arg2[%649] : memref<50xf32, #tpu.memory_space<smem>>
    %651 = vector.broadcast %650 : f32 to vector<8x128xf32>
    %652 = arith.mulf %0, %651 : vector<8x128xf32>
    %653 = arith.index_cast %c46_i32 : i32 to index
    %654 = memref.load %arg3[%653] : memref<50xf32, #tpu.memory_space<smem>>
    %655 = vector.broadcast %654 : f32 to vector<8x128xf32>
    %656 = arith.addf %652, %655 : vector<8x128xf32>
    %657 = math.tanh %656 : vector<8x128xf32>
    %658 = arith.index_cast %c46_i32 : i32 to index
    %659 = memref.load %arg4[%658] : memref<50xf32, #tpu.memory_space<smem>>
    %660 = vector.broadcast %659 : f32 to vector<8x128xf32>
    %661 = arith.mulf %660, %657 : vector<8x128xf32>
    %662 = arith.addf %648, %661 : vector<8x128xf32>
    %c47_i32 = arith.constant 47 : i32
    %663 = arith.index_cast %c47_i32 : i32 to index
    %664 = memref.load %arg2[%663] : memref<50xf32, #tpu.memory_space<smem>>
    %665 = vector.broadcast %664 : f32 to vector<8x128xf32>
    %666 = arith.mulf %0, %665 : vector<8x128xf32>
    %667 = arith.index_cast %c47_i32 : i32 to index
    %668 = memref.load %arg3[%667] : memref<50xf32, #tpu.memory_space<smem>>
    %669 = vector.broadcast %668 : f32 to vector<8x128xf32>
    %670 = arith.addf %666, %669 : vector<8x128xf32>
    %671 = math.tanh %670 : vector<8x128xf32>
    %672 = arith.index_cast %c47_i32 : i32 to index
    %673 = memref.load %arg4[%672] : memref<50xf32, #tpu.memory_space<smem>>
    %674 = vector.broadcast %673 : f32 to vector<8x128xf32>
    %675 = arith.mulf %674, %671 : vector<8x128xf32>
    %676 = arith.addf %662, %675 : vector<8x128xf32>
    %c48_i32 = arith.constant 48 : i32
    %677 = arith.index_cast %c48_i32 : i32 to index
    %678 = memref.load %arg2[%677] : memref<50xf32, #tpu.memory_space<smem>>
    %679 = vector.broadcast %678 : f32 to vector<8x128xf32>
    %680 = arith.mulf %0, %679 : vector<8x128xf32>
    %681 = arith.index_cast %c48_i32 : i32 to index
    %682 = memref.load %arg3[%681] : memref<50xf32, #tpu.memory_space<smem>>
    %683 = vector.broadcast %682 : f32 to vector<8x128xf32>
    %684 = arith.addf %680, %683 : vector<8x128xf32>
    %685 = math.tanh %684 : vector<8x128xf32>
    %686 = arith.index_cast %c48_i32 : i32 to index
    %687 = memref.load %arg4[%686] : memref<50xf32, #tpu.memory_space<smem>>
    %688 = vector.broadcast %687 : f32 to vector<8x128xf32>
    %689 = arith.mulf %688, %685 : vector<8x128xf32>
    %690 = arith.addf %676, %689 : vector<8x128xf32>
    %c49_i32 = arith.constant 49 : i32
    %691 = arith.index_cast %c49_i32 : i32 to index
    %692 = memref.load %arg2[%691] : memref<50xf32, #tpu.memory_space<smem>>
    %693 = vector.broadcast %692 : f32 to vector<8x128xf32>
    %694 = arith.mulf %0, %693 : vector<8x128xf32>
    %695 = arith.index_cast %c49_i32 : i32 to index
    %696 = memref.load %arg3[%695] : memref<50xf32, #tpu.memory_space<smem>>
    %697 = vector.broadcast %696 : f32 to vector<8x128xf32>
    %698 = arith.addf %694, %697 : vector<8x128xf32>
    %699 = math.tanh %698 : vector<8x128xf32>
    %700 = arith.index_cast %c49_i32 : i32 to index
    %701 = memref.load %arg4[%700] : memref<50xf32, #tpu.memory_space<smem>>
    %702 = vector.broadcast %701 : f32 to vector<8x128xf32>
    %703 = arith.mulf %702, %699 : vector<8x128xf32>
    %704 = arith.addf %690, %703 : vector<8x128xf32>
    %c50_i32 = arith.constant 50 : i32
    %c0_2 = arith.constant 0 : index
    %c0_3 = arith.constant 0 : index
    %705 = vector.load %arg6[%c0_2, %c0_3] : memref<8x128xf32, #tpu.memory_space<vmem>>, vector<8x128xf32>
    tpu.vector_store %arg6[%c0_2, %c0_3], %704 {strides = array<i32>} : memref<8x128xf32, #tpu.memory_space<vmem>>, vector<8x128xf32>,
    return
  }
  func.func @transform_0(%arg0: i32) -> (i32, i32) {
    %c0_i32 = arith.constant 0 : i32
    %c0_i32_0 = arith.constant 0 : i32
    return %arg0, %c0_i32 : i32, i32
  }
  func.func @transform_1(%arg0: i32) -> i32 {
    %c0_i32 = arith.constant 0 : i32
    %c0_i32_0 = arith.constant 0 : i32
    return %c0_i32 : i32
  }
  func.func @transform_2(%arg0: i32) -> i32 {
    %c0_i32 = arith.constant 0 : i32
    %c0_i32_0 = arith.constant 0 : i32
    return %c0_i32 : i32
  }
  func.func @transform_3(%arg0: i32) -> i32 {
    %c0_i32 = arith.constant 0 : i32
    %c0_i32_0 = arith.constant 0 : i32
    return %c0_i32 : i32
  }
  func.func @transform_4(%arg0: i32) -> i32 {
    %c0_i32 = arith.constant 0 : i32
    %c0_i32_0 = arith.constant 0 : i32
    return %c0_i32 : i32
  }
  func.func @transform_5(%arg0: i32) -> (i32, i32) {
    %c0_i32 = arith.constant 0 : i32
    %c0_i32_0 = arith.constant 0 : i32
    return %arg0, %c0_i32 : i32, i32
  }
}

</mosaic_0001>

<bundles_post_ra>
// kernel: tpu_custom_call.1
= control target key start
LH: loop header
LB: loop body
LE: loop exit
PB: predicated region body
PF: predicated region fallthrough
CT: control target
= control target key end

     0   :  { %11 = vsyncpa [#allocation4], 0  ;;  %s1522_s0 = inlined_call_operand.hbm [shape: f32[8,128], index: 0, kind: input, shape index: {}]   ;;  %s1523_s1 = inlined_call_operand.vmem [shape: f32[50], index: 1, kind: input, shape index: {}]   ;;  %s1524_s2 = inlined_call_operand.vmem [shape: f32[50], index: 2, kind: input, shape index: {}]   ;;  %s1525_s3 = inlined_call_operand.vmem [shape: f32[50], index: 3, kind: input, shape index: {}]   ;;  %s1526_s4 = inlined_call_operand.<no memory space> [shape: f32[1], index: 4, kind: input, shape index: {}]   ;;  %s1527_s5 = inlined_call_operand.hbm [shape: f32[8,128], index: 5, kind: output, shape index: {}]  }
   0x1   :  { %12 = vsyncpa [#allocation6], 0 }
   0x2   :  { %13 = vsyncpa [#allocation9], 0  ;;  %s41_s20 = sshll.u32 %s1524_s2, 4  ;;  %s42_s20 = int_to_ptr.vmem [resolvable:$true] %s41_s20 }
   0x3   :  { %14 = vsyncpa [#allocation5], 0  ;;  %s895_s21 = scalar_lea.vmem %s42_s20, 16  ;;  %p900_p1 = scmp.lt.s32.totalorder %s42_s20, %s42_s20 }
   0x4   :  { %p896_p0 = scmp.ne.s32.totalorder %s42_s20, %s895_s21  ;;  %p901_p2 = scmp.lt.s32.totalorder %s895_s21, %s895_s21 }
   0x6   :  { %p902_p3 = por %p901_p2, %p900_p1 }
   0x8   :  { %p903_p4 = pnand %p902_p3, %p896_p0 }
   0xa   :  { %906 = shalt.err (!%p903_p4)
}
   0xb   :  { %s983_s22 = smov [#allocation8]   ;;  %s984_s23 = smov [#allocation3]  }
   0xc   :  { %44 = dma.vmem_to_smem %s42_s20, 16, %s983_s22, [#allocation9]  }
   0xd   :  { %s21_s24 = sshll.u32 %s984_s23, 4  ;;  %s31_s27 = sshll.u32 %s1523_s1, 4  ;;  %s22_s24 = int_to_ptr.vmem [resolvable:$true] %s21_s24  ;;  %s32_s27 = int_to_ptr.vmem [resolvable:$true] %s31_s27 }
   0xe   :  { %s907_s29 = scalar_lea.hbm %s1522_s0, 128 }
   0xf   :  { %p908_p5 = scmp.ne.s32.totalorder %s1522_s0, %s907_s29  ;;  %p911_p6 = scmp.lt.u32.totalorder %s907_s29, %s1522_s0 }
  0x11   :  { %p913_p7 = pnand %p911_p6, %p908_p5 }
  0x13   :  { %916 = shalt.err (!%p913_p7)
}
  0x14   :  { %s917_s9 = scalar_lea.vmem %s22_s24, 128  ;;  %p922_p9 = scmp.lt.s32.totalorder %s22_s24, %s22_s24 }
  0x15   :  { %p918_p8 = scmp.ne.s32.totalorder %s22_s24, %s917_s9  ;;  %p923_p10 = scmp.lt.s32.totalorder %s917_s9, %s917_s9 }
  0x17   :  { %p924_p11 = por %p923_p10, %p922_p9 }
  0x19   :  { %p925_p12 = pnand %p924_p11, %p918_p8 }
  0x1b   :  { %928 = shalt.err (!%p925_p12)
}
  0x1c   :  { %24 = dma.hbm_to_vmem [thread:$0]  %s1522_s0, 128, %s22_s24, [#allocation4]  }
  0x1d   :  { %s51_s13 = sshll.u32 %s1525_s3, 4  ;;  %s929_s14 = scalar_lea.vmem %s32_s27, 16  ;;  %s52_s13 = int_to_ptr.vmem [resolvable:$true] %s51_s13 }
  0x1e   :  { %p930_p13 = scmp.ne.s32.totalorder %s32_s27, %s929_s14  ;;  %p934_p0 = scmp.lt.s32.totalorder %s32_s27, %s32_s27 }
  0x1f   :  { %p935_p1 = scmp.lt.s32.totalorder %s929_s14, %s929_s14 }
  0x21   :  { %p936_p2 = por %p935_p1, %p934_p0 }
  0x23   :  { %p937_p3 = pnand %p936_p2, %p930_p13 }
  0x25   :  { %940 = shalt.err (!%p937_p3)
}
  0x26   :  { %s985_s15 = smov [#allocation7]   ;;  %s941_s16 = scalar_lea.vmem %s52_s13, 16 }
  0x27   :  { %34 = dma.vmem_to_smem %s32_s27, 16, %s985_s15, [#allocation6]  }
  0x28   :  { %p942_p4 = scmp.ne.s32.totalorder %s52_s13, %s941_s16  ;;  %p946_p5 = scmp.lt.s32.totalorder %s52_s13, %s52_s13 }
  0x29   :  { %p947_p6 = scmp.lt.s32.totalorder %s941_s16, %s941_s16 }
  0x2b   :  { %p948_p7 = por %p947_p6, %p946_p5 }
  0x2d   :  { %p949_p8 = pnand %p948_p7, %p942_p4 }
  0x2f   :  { %952 = shalt.err (!%p949_p8)
}
  0x30   :  { %s986_s0 = smov [#allocation10]  }
  0x31   :  { %54 = dma.vmem_to_smem %s52_s13, 16, %s986_s0, [#allocation9]  }
  0x32   :  { %975 = dma.done.wait [#allocation4], 128  }
  0x33   :  { %976 = vsyncadd [#allocation4], 4294967168 }
  0x34   :  { %977 = dma.done.wait [#allocation6], 16  }
  0x35   :  { %978 = vsyncadd [#allocation6], 4294967280 }
  0x36   :  { %979 = dma.done.wait [#allocation9], 32  }
  0x37   :  { %980 = vsyncadd [#allocation9], 4294967264 }
  0x38   :  { %69 = sfence }
  0x39   :  { %s74_s3 = sld [smem:[#allocation7]]  ;;  %s642_s18 = sld [smem:[#allocation7 + $0x1]]  ;;  %v1041_v0 = vld [vmem:[#allocation3] sm:$0xff]  ;;  %v72_v26 = vstv %s1526_s4 }
  0x3a   :  { %s77_s17 = sld [smem:[#allocation8]]  ;;  %s643_s19 = sld [smem:[#allocation8 + $0x1]] }
  0x3b   :  { %s645_s20 = sld [smem:[#allocation7 + $0x2]]  ;;  %s648_s22 = sld [smem:[#allocation7 + $0x3]] }
  0x3c   :  { %s1039_s21 = sld [smem:[#allocation8 + $0x2]]  ;;  %s1043_s23 = sld [smem:[#allocation8 + $0x3]] }
  0x3d   :  { %s1045_s24 = sld [smem:[#allocation7 + $0x4]]  ;;  %s1050_s26 = sld [smem:[#allocation7 + $0x5]] }
  0x3e   :  { %s1047_s25 = sld [smem:[#allocation8 + $0x4]]  ;;  %s1052_s27 = sld [smem:[#allocation10]] }
  0x3f   :  { %v75_v1 = vstv %s74_s3  ;;  %v86_v4 = vstv %s642_s18  ;;  %s1055_s2 = sld [smem:[#allocation8 + $0x5]]  ;;  %s1058_s28 = sld [smem:[#allocation7 + $0x6]] }
  0x40   :  { %v78_v2 = vstv %s77_s17  ;;  %v76_v3 = vmul.f32 %v75_v1, %v1041_v0  ;;  %v87_v5 = vmul.f32 %v86_v4, %v1041_v0  ;;  %v89_v6 = vstv %s643_s19  ;;  %s1060_s29 = sld [smem:[#allocation8 + $0x6]]  ;;  %s1062_s30 = sld [smem:[#allocation10 + $0x1]] }
  0x41   :  { %v97_v8 = vstv %s645_s20  ;;  %v108_v12 = vstv %s648_s22  ;;  %s1065_s6 = sld [smem:[#allocation7 + $0x7]]  ;;  %s1067_s7 = sld [smem:[#allocation10 + $0x2]] }
  0x42   :  { %v79_v7 = vadd.f32 %v78_v2, %v76_v3  ;;  %v100_v9 = vstv %s1039_s21  ;;  %v90_v10 = vadd.f32 %v89_v6, %v87_v5  ;;  %v98_v11 = vmul.f32 %v97_v8, %v1041_v0  ;;  %s1071_s8 = sld [smem:[#allocation8 + $0x7]]  ;;  %s1075_s9 = sld [smem:[#allocation7 + $0x8]] }
  0x43   :  { %v109_v13 = vmul.f32 %v108_v12, %v1041_v0  ;;  %v111_v14 = vstv %s1043_s23  ;;  %v119_v16 = vstv %s1045_s24  ;;  %s1077_s1 = sld [smem:[#allocation8 + $0x8]]  ;;  %v130_v20 = vstv %s1050_s26  ;;  %s1081_s10 = sld [smem:[#allocation7 + $0x9]] }
  0x44   :  { %794 = vtanh.f32 %v79_v7  ;;  %v101_v15 = vadd.f32 %v100_v9, %v98_v11  ;;  %v122_v17 = vstv %s1047_s25  ;;  %v120_v19 = vmul.f32 %v119_v16, %v1041_v0  ;;  %s1083_s11 = sld [smem:[#allocation10 + $0x3]]  ;;  %s1087_s12 = sld [smem:[#allocation8 + $0x9]] }
  0x45   :  { %796 = vtanh.f32 %v90_v10  ;;  %v112_v18 = vadd.f32 %v111_v14, %v109_v13  ;;  %v131_v21 = vmul.f32 %v130_v20, %v1041_v0  ;;  %v133_v22 = vstv %s1055_s2  ;;  %s1091_s13 = sld [smem:[#allocation7 + $0xa]]  ;;  %s1098_s0 = sld [smem:[#allocation10 + $0x4]] }
  0x46   :  { %798 = vtanh.f32 %v101_v15  ;;  %v123_v23 = vadd.f32 %v122_v17, %v120_v19  ;;  %v141_v24 = vstv %s1058_s28  ;;  %v144_v25 = vstv %s1060_s29  ;;  %s1093_s14 = sld [smem:[#allocation8 + $0xa]]  ;;  %s1102_s3 = sld [smem:[#allocation7 + $0xb]] }
  0x47   :  { %800 = vtanh.f32 %v112_v18  ;;  %v134_v27 = vadd.f32 %v133_v22, %v131_v21  ;;  %v142_v28 = vmul.f32 %v141_v24, %v1041_v0  ;;  %v152_v29 = vstv %s1065_s6  ;;  %s1105_s17 = sld [smem:[#allocation10 + $0x5]]  ;;  %s1109_s18 = sld [smem:[#allocation8 + $0xb]] }
  0x48   :  { %v82_v30 = vstv %s1052_s27  ;;  %802 = vtanh.f32 %v123_v23  ;;  %v153_v31 = vmul.f32 %v152_v29, %v1041_v0  ;;  %v155_v32 = vstv %s1071_s8  ;;  %s1113_s4 = sld [smem:[#allocation7 + $0xc]]  ;;  %s1120_s20 = sld [smem:[#allocation7 + $0xd]] }
  0x49   :  { %804 = vtanh.f32 %v134_v27  ;;  %v145_v33 = vadd.f32 %v144_v25, %v142_v28  ;;  %v163_v34 = vstv %s1075_s9  ;;  %v166_v35 = vstv %s1077_s1  ;;  %s1115_s19 = sld [smem:[#allocation8 + $0xc]]  ;;  %s1123_s21 = sld [smem:[#allocation10 + $0x6]] }
  0x4a   :  { %v93_v36 = vstv %s1062_s30  ;;  %v156_v37 = vadd.f32 %v155_v32, %v153_v31  ;;  %v164_v38 = vmul.f32 %v163_v34, %v1041_v0  ;;  %v174_v39 = vstv %s1081_s10  ;;  %s1127_s22 = sld [smem:[#allocation8 + $0xd]]  ;;  %s1131_s23 = sld [smem:[#allocation7 + $0xe]] }
  0x4b   :  { %v104_v40 = vstv %s1067_s7  ;;  %806 = vtanh.f32 %v145_v33  ;;  %v175_v41 = vmul.f32 %v174_v39, %v1041_v0  ;;  %v177_v42 = vstv %s1087_s12  ;;  %s1135_s24 = sld [smem:[#allocation8 + $0xe]]  ;;  %s1137_s25 = sld [smem:[#allocation10 + $0x7]] }
  0x4c   :  { %808 = vtanh.f32 %v156_v37  ;;  %v167_v44 = vadd.f32 %v166_v35, %v164_v38  ;;  %v185_v45 = vstv %s1091_s13  ;;  %v188_v46 = vstv %s1093_s14  ;;  %s1141_s26 = sld [smem:[#allocation7 + $0xf]]  ;;  %s1144_s27 = sld [smem:[#allocation10 + $0x8]] }
  0x4d   :  { %v115_v49 = vstv %s1083_s11  ;;  %v178_v50 = vadd.f32 %v177_v42, %v175_v41  ;;  %v186_v51 = vmul.f32 %v185_v45, %v1041_v0  ;;  %v196_v53 = vstv %s1102_s3  ;;  %s1149_s2 = sld [smem:[#allocation8 + $0xf]]  ;;  %s1151_s28 = sld [smem:[#allocation7 + $0x10]] }
  0x4e   :  { %v795_v43 = vpop.eup %794  ;;  %810 = vtanh.f32 %v167_v44  ;;  %v199_v54 = vstv %s1109_s18  ;;  %v126_v57 = vstv %s1098_s0  ;;  %v197_v59 = vmul.f32 %v196_v53, %v1041_v0  ;;  %s1153_s29 = sld [smem:[#allocation10 + $0x9]]  ;;  %s1159_s30 = sld [smem:[#allocation8 + $0x10]] }
  0x4f   :  { %v797_v47 = vpop.eup %796  ;;  %v83_v48 = vmul.f32 %v795_v43, %v82_v30  ;;  %v189_v58 = vadd.f32 %v188_v46, %v186_v51  ;;  %v137_v62 = vstv %s1105_s17  ;;  %812 = vtanh.f32 %v178_v50  ;;  %s1163_s6 = sld [smem:[#allocation7 + $0x11]]  ;;  %s1167_s8 = sld [smem:[#allocation10 + $0xa]] }
  0x50   :  { %v94_v52 = vmul.f32 %v797_v47, %v93_v36  ;;  %v799_v55 = vpop.eup %798  ;;  %v207_v63 = vstv %s1113_s4  ;;  %v200_v3 = vadd.f32 %v199_v54, %v197_v59  ;;  %v210_v4 = vstv %s1115_s19  ;;  %s1165_s7 = sld [smem:[#allocation8 + $0x11]]  ;;  %s1169_s9 = sld [smem:[#allocation10 + $0xb]] }
  0x51   :  { %v84_v56 = vadd.f32 %v83_v48, %v72_v26  ;;  %v801_v60 = vpop.eup %800  ;;  %v105_v61 = vmul.f32 %v799_v55, %v104_v40  ;;  %814 = vtanh.f32 %v189_v58  ;;  %v208_v6 = vmul.f32 %v207_v63, %v1041_v0  ;;  %s1174_s1 = sld [smem:[#allocation7 + $0x12]]  ;;  %s1179_s11 = sld [smem:[#allocation10 + $0xc]] }
  0x52   :  { %v116_v2 = vmul.f32 %v801_v60, %v115_v49  ;;  %v803_v5 = vpop.eup %802  ;;  %v218_v7 = vstv %s1120_s20  ;;  %v221_v8 = vstv %s1127_s22  ;;  %v148_v12 = vstv %s1123_s21  ;;  %s1176_s10 = sld [smem:[#allocation8 + $0x12]]  ;;  %s1183_s12 = sld [smem:[#allocation7 + $0x13]] }
  0x53   :  { %v95_v1 = vadd.f32 %v94_v52, %v84_v56  ;;  %v805_v9 = vpop.eup %804  ;;  %v127_v11 = vmul.f32 %v803_v5, %v126_v57  ;;  %v219_v13 = vmul.f32 %v218_v7, %v1041_v0  ;;  %816 = vtanh.f32 %v200_v3  ;;  %s1185_s13 = sld [smem:[#allocation8 + $0x13]]  ;;  %s1190_s14 = sld [smem:[#allocation7 + $0x14]] }
  0x54   :  { %v138_v14 = vmul.f32 %v805_v9, %v137_v62  ;;  %v211_v15 = vadd.f32 %v210_v4, %v208_v6  ;;  %v229_v16 = vstv %s1131_s23  ;;  %v232_v21 = vstv %s1135_s24  ;;  %s1194_s15 = sld [smem:[#allocation8 + $0x14]]  ;;  %s1196_s16 = sld [smem:[#allocation10 + $0xd]] }
  0x55   :  { %v106_v10 = vadd.f32 %v105_v61, %v95_v1  ;;  %v807_v17 = vpop.eup %806  ;;  %v222_v19 = vadd.f32 %v221_v8, %v219_v13  ;;  %v230_v20 = vmul.f32 %v229_v16, %v1041_v0  ;;  %v159_v23 = vstv %s1137_s25  ;;  %s1201_s0 = sld [smem:[#allocation7 + $0x15]]  ;;  %s1207_s17 = sld [smem:[#allocation10 + $0xe]] }
  0x56   :  { %v809_v22 = vpop.eup %808  ;;  %818 = vtanh.f32 %v211_v15  ;;  %v240_v24 = vstv %s1141_s26  ;;  %v149_v26 = vmul.f32 %v807_v17, %v148_v12  ;;  %v170_v27 = vstv %s1144_s27  ;;  %s1203_s3 = sld [smem:[#allocation8 + $0x15]]  ;;  %s1209_s18 = sld [smem:[#allocation10 + $0xf]] }
  0x57   :  { %v117_v18 = vadd.f32 %v116_v2, %v106_v10  ;;  %v233_v28 = vadd.f32 %v232_v21, %v230_v20  ;;  %820 = vtanh.f32 %v222_v19  ;;  %v241_v30 = vmul.f32 %v240_v24, %v1041_v0  ;;  %s1214_s4 = sld [smem:[#allocation7 + $0x16]]  ;;  %s1220_s20 = sld [smem:[#allocation7 + $0x17]] }
  0x58   :  { %v811_v29 = vpop.eup %810  ;;  %v243_v31 = vstv %s1149_s2  ;;  %v251_v32 = vstv %s1151_s28  ;;  %v160_v34 = vmul.f32 %v809_v22, %v159_v23  ;;  %v181_v35 = vstv %s1153_s29  ;;  %s1216_s19 = sld [smem:[#allocation8 + $0x16]]  ;;  %s1224_s21 = sld [smem:[#allocation8 + $0x17]] }
  0x59   :  { %v128_v25 = vadd.f32 %v127_v11, %v117_v18  ;;  %v252_v36 = vmul.f32 %v251_v32, %v1041_v0  ;;  %v813_v37 = vpop.eup %812  ;;  %v171_v38 = vmul.f32 %v811_v29, %v170_v27  ;;  %822 = vtanh.f32 %v233_v28  ;;  %s1226_s22 = sld [smem:[#allocation10 + $0x10]]  ;;  %s1237_s25 = sld [smem:[#allocation10 + $0x11]] }
  0x5a   :  { %v244_v39 = vadd.f32 %v243_v31, %v241_v30  ;;  %v254_v40 = vstv %s1159_s30  ;;  %v262_v43 = vstv %s1163_s6  ;;  %v265_v44 = vstv %s1165_s7  ;;  %s1232_s23 = sld [smem:[#allocation7 + $0x18]]  ;;  %s1239_s26 = sld [smem:[#allocation7 + $0x19]] }
  0x5b   :  { %v139_v33 = vadd.f32 %v138_v14, %v128_v25  ;;  %v255_v42 = vadd.f32 %v254_v40, %v252_v36  ;;  %v815_v45 = vpop.eup %814  ;;  %v192_v46 = vstv %s1167_s8  ;;  %v203_v47 = vstv %s1169_s9  ;;  %s1234_s24 = sld [smem:[#allocation8 + $0x18]]  ;;  %s1241_s27 = sld [smem:[#allocation10 + $0x12]] }
  0x5c   :  { %824 = vtanh.f32 %v244_v39  ;;  %v263_v48 = vmul.f32 %v262_v43, %v1041_v0  ;;  %v182_v50 = vmul.f32 %v813_v37, %v181_v35  ;;  %v273_v51 = vstv %s1174_s1  ;;  %s1248_s2 = sld [smem:[#allocation8 + $0x19]]  ;;  %s1250_s28 = sld [smem:[#allocation7 + $0x1a]] }
  0x5d   :  { %v150_v41 = vadd.f32 %v149_v26, %v139_v33  ;;  %v276_v52 = vstv %s1176_s10  ;;  %v817_v53 = vpop.eup %816  ;;  %v214_v54 = vstv %s1179_s11  ;;  %826 = vtanh.f32 %v255_v42  ;;  %s1252_s29 = sld [smem:[#allocation10 + $0x13]]  ;;  %s1258_s30 = sld [smem:[#allocation8 + $0x1a]] }
  0x5e   :  { %v266_v55 = vadd.f32 %v265_v44, %v263_v48  ;;  %v274_v56 = vmul.f32 %v273_v51, %v1041_v0  ;;  %v193_v58 = vmul.f32 %v815_v45, %v192_v46  ;;  %v284_v59 = vstv %s1183_s12  ;;  %s1260_s6 = sld [smem:[#allocation7 + $0x1b]]  ;;  %s1262_s7 = sld [smem:[#allocation10 + $0x14]] }
  0x5f   :  { %v161_v49 = vadd.f32 %v160_v34, %v150_v41  ;;  %v287_v60 = vstv %s1185_s13  ;;  %v285_v63 = vmul.f32 %v284_v59, %v1041_v0  ;;  %v295_v1 = vstv %s1190_s14  ;;  %s1267_s8 = sld [smem:[#allocation10 + $0x15]]  ;;  %s1269_s9 = sld [smem:[#allocation8 + $0x1b]] }
  0x60   :  { %v819_v61 = vpop.eup %818  ;;  %828 = vtanh.f32 %v266_v55  ;;  %v277_v62 = vadd.f32 %v276_v52, %v274_v56  ;;  %v204_v3 = vmul.f32 %v817_v53, %v203_v47  ;;  %v296_v4 = vmul.f32 %v295_v1, %v1041_v0  ;;  %s1273_s1 = sld [smem:[#allocation7 + $0x1c]]  ;;  %s1280_s11 = sld [smem:[#allocation7 + $0x1d]] }
  0x61   :  { %v172_v57 = vadd.f32 %v171_v38, %v161_v49  ;;  %v298_v5 = vstv %s1194_s15  ;;  %v821_v6 = vpop.eup %820  ;;  %v215_v7 = vmul.f32 %v819_v61, %v214_v54  ;;  %v225_v8 = vstv %s1196_s16  ;;  %s1275_s10 = sld [smem:[#allocation8 + $0x1c]]  ;;  %s1284_s12 = sld [smem:[#allocation8 + $0x1d]] }
  0x62   :  { %830 = vtanh.f32 %v277_v62  ;;  %v288_v9 = vadd.f32 %v287_v60, %v285_v63  ;;  %v299_v11 = vadd.f32 %v298_v5, %v296_v4  ;;  %v306_v12 = vstv %s1201_s0  ;;  %s1286_s13 = sld [smem:[#allocation10 + $0x16]]  ;;  %s1292_s15 = sld [smem:[#allocation10 + $0x17]] }
  0x63   :  { %v183_v2 = vadd.f32 %v182_v50, %v172_v57  ;;  %v309_v13 = vstv %s1203_s3  ;;  %v823_v14 = vpop.eup %822  ;;  %v236_v15 = vstv %s1207_s17  ;;  %v247_v16 = vstv %s1209_s18  ;;  %s1290_s14 = sld [smem:[#allocation7 + $0x1e]]  ;;  %s1296_s16 = sld [smem:[#allocation10 + $0x18]] }
  0x64   :  { %832 = vtanh.f32 %v288_v9  ;;  %v307_v17 = vmul.f32 %v306_v12, %v1041_v0  ;;  %v226_v19 = vmul.f32 %v821_v6, %v225_v8  ;;  %v317_v20 = vstv %s1214_s4  ;;  %s1300_s0 = sld [smem:[#allocation8 + $0x1e]]  ;;  %s1303_s3 = sld [smem:[#allocation7 + $0x1f]] }
  0x65   :  { %v194_v10 = vadd.f32 %v193_v58, %v183_v2  ;;  %v320_v21 = vstv %s1216_s19  ;;  %834 = vtanh.f32 %v299_v11  ;;  %v318_v24 = vmul.f32 %v317_v20, %v1041_v0  ;;  %s1308_s17 = sld [smem:[#allocation8 + $0x1f]]  ;;  %s1310_s18 = sld [smem:[#allocation7 + $0x20]] }
  0x66   :  { %v825_v22 = vpop.eup %824  ;;  %v310_v23 = vadd.f32 %v309_v13, %v307_v17  ;;  %v328_v25 = vstv %s1220_s20  ;;  %v237_v27 = vmul.f32 %v823_v14, %v236_v15  ;;  %v331_v29 = vstv %s1224_s21  ;;  %s1312_s4 = sld [smem:[#allocation10 + $0x19]]  ;;  %s1318_s19 = sld [smem:[#allocation8 + $0x20]] }
  0x67   :  { %v205_v18 = vadd.f32 %v204_v3, %v194_v10  ;;  %v329_v28 = vmul.f32 %v328_v25, %v1041_v0  ;;  %v827_v30 = vpop.eup %826  ;;  %v248_v31 = vmul.f32 %v825_v22, %v247_v16  ;;  %v258_v32 = vstv %s1226_s22  ;;  %s1322_s20 = sld [smem:[#allocation7 + $0x21]]  ;;  %s1327_s22 = sld [smem:[#allocation10 + $0x1a]] }
  0x68   :  { %836 = vtanh.f32 %v310_v23  ;;  %v321_v33 = vadd.f32 %v320_v21, %v318_v24  ;;  %v339_v36 = vstv %s1232_s23  ;;  %v342_v37 = vstv %s1234_s24  ;;  %s1324_s21 = sld [smem:[#allocation8 + $0x21]]  ;;  %s1329_s23 = sld [smem:[#allocation10 + $0x1b]] }
  0x69   :  { %v216_v26 = vadd.f32 %v215_v7, %v205_v18  ;;  %v332_v35 = vadd.f32 %v331_v29, %v329_v28  ;;  %v269_v39 = vstv %s1237_s25  ;;  %v340_v40 = vmul.f32 %v339_v36, %v1041_v0  ;;  %s1333_s24 = sld [smem:[#allocation7 + $0x22]] }
  0x6a   :  { %v829_v38 = vpop.eup %828  ;;  %838 = vtanh.f32 %v321_v33  ;;  %v350_v41 = vstv %s1239_s26  ;;  %v259_v43 = vmul.f32 %v827_v30, %v258_v32  ;;  %v280_v44 = vstv %s1241_s27  ;;  %s1335_s25 = sld [smem:[#allocation8 + $0x22]]  ;;  %s1340_s26 = sld [smem:[#allocation7 + $0x23]] }
  0x6b   :  { %v227_v34 = vadd.f32 %v226_v19, %v216_v26  ;;  %v351_v45 = vmul.f32 %v350_v41, %v1041_v0  ;;  %840 = vtanh.f32 %v332_v35  ;;  %v343_v47 = vadd.f32 %v342_v37, %v340_v40  ;;  %s1343_s27 = sld [smem:[#allocation8 + $0x23]] }
  0x6c   :  { %v831_v46 = vpop.eup %830  ;;  %v353_v48 = vstv %s1248_s2  ;;  %v361_v49 = vstv %s1250_s28  ;;  %v270_v51 = vmul.f32 %v829_v38, %v269_v39  ;;  %v291_v55 = vstv %s1252_s29  ;;  %s1345_s2 = sld [smem:[#allocation10 + $0x1c]]  ;;  %s1353_s29 = sld [smem:[#allocation10 + $0x1d]] }
  0x6d   :  { %v238_v42 = vadd.f32 %v237_v27, %v227_v34  ;;  %v354_v52 = vadd.f32 %v353_v48, %v351_v45  ;;  %v362_v53 = vmul.f32 %v361_v49, %v1041_v0  ;;  %842 = vtanh.f32 %v343_v47  ;;  %s1350_s28 = sld [smem:[#allocation7 + $0x24]] }
  0x6e   :  { %v833_v54 = vpop.eup %832  ;;  %v364_v56 = vstv %s1258_s30  ;;  %v372_v57 = vstv %s1260_s6  ;;  %v281_v59 = vmul.f32 %v831_v46, %v280_v44  ;;  %v302_v60 = vstv %s1262_s7  ;;  %s1356_s30 = sld [smem:[#allocation10 + $0x1e]]  ;;  %s1359_s6 = sld [smem:[#allocation8 + $0x24]] }
  0x6f   :  { %v249_v50 = vadd.f32 %v248_v31, %v238_v42  ;;  %v365_v61 = vadd.f32 %v364_v56, %v362_v53  ;;  %v835_v62 = vpop.eup %834  ;;  %v313_v63 = vstv %s1267_s8  ;;  %844 = vtanh.f32 %v354_v52  ;;  %s1363_s7 = sld [smem:[#allocation7 + $0x25]]  ;;  %s1367_s8 = sld [smem:[#allocation10 + $0x1f]] }
  0x70   :  { %v373_v1 = vmul.f32 %v372_v57, %v1041_v0  ;;  %v375_v2 = vstv %s1269_s9  ;;  %v292_v4 = vmul.f32 %v833_v54, %v291_v55  ;;  %v383_v5 = vstv %s1273_s1  ;;  %s1370_s9 = sld [smem:[#allocation8 + $0x25]]  ;;  %s1374_s1 = sld [smem:[#allocation7 + $0x26]] }
  0x71   :  { %v260_v58 = vadd.f32 %v259_v43, %v249_v50  ;;  %v386_v6 = vstv %s1275_s10  ;;  %846 = vtanh.f32 %v365_v61  ;;  %v384_v9 = vmul.f32 %v383_v5, %v1041_v0  ;;  %s1376_s10 = sld [smem:[#allocation8 + $0x26]] }
  0x72   :  { %v837_v7 = vpop.eup %836  ;;  %v376_v8 = vadd.f32 %v375_v2, %v373_v1  ;;  %v394_v10 = vstv %s1280_s11  ;;  %v303_v12 = vmul.f32 %v835_v62, %v302_v60  ;;  %v397_v14 = vstv %s1284_s12  ;;  %s1380_s11 = sld [smem:[#allocation7 + $0x27]] }
  0x73   :  { %v271_v3 = vadd.f32 %v270_v51, %v260_v58  ;;  %v395_v13 = vmul.f32 %v394_v10, %v1041_v0  ;;  %v324_v16 = vstv %s1286_s13  ;;  %v387_v17 = vadd.f32 %v386_v6, %v384_v9  ;;  %s1384_s12 = sld [smem:[#allocation8 + $0x27]]  ;;  %s1387_s13 = sld [smem:[#allocation10 + $0x20]] }
  0x74   :  { %v839_v15 = vpop.eup %838  ;;  %848 = vtanh.f32 %v376_v8  ;;  %v405_v18 = vstv %s1290_s14  ;;  %v314_v20 = vmul.f32 %v837_v7, %v313_v63  ;;  %v335_v24 = vstv %s1292_s15  ;;  %s1391_s14 = sld [smem:[#allocation7 + $0x28]] }
  0x75   :  { %v282_v11 = vadd.f32 %v281_v59, %v271_v3  ;;  %v398_v21 = vadd.f32 %v397_v14, %v395_v13  ;;  %v406_v22 = vmul.f32 %v405_v18, %v1041_v0  ;;  %v841_v23 = vpop.eup %840  ;;  %v346_v25 = vstv %s1296_s16  ;;  %s1393_s15 = sld [smem:[#allocation8 + $0x28]]  ;;  %s1397_s16 = sld [smem:[#allocation10 + $0x21]] }
  0x76   :  { %850 = vtanh.f32 %v387_v17  ;;  %v408_v26 = vstv %s1300_s0  ;;  %v325_v28 = vmul.f32 %v839_v15, %v324_v16  ;;  %v416_v30 = vstv %s1303_s3  ;;  %s1400_s0 = sld [smem:[#allocation7 + $0x29]]  ;;  %s1402_s3 = sld [smem:[#allocation10 + $0x22]] }
  0x77   :  { %v293_v19 = vadd.f32 %v292_v4, %v282_v11  ;;  %v409_v29 = vadd.f32 %v408_v26, %v406_v22  ;;  %v843_v31 = vpop.eup %842  ;;  %852 = vtanh.f32 %v398_v21  ;;  %v417_v32 = vmul.f32 %v416_v30, %v1041_v0 }
  0x78   :  { %v419_v33 = vstv %s1308_s17  ;;  %v427_v34 = vstv %s1310_s18  ;;  %v336_v36 = vmul.f32 %v841_v23, %v335_v24  ;;  %v357_v37 = vstv %s1312_s4  ;;  %s1408_s17 = sld [smem:[#allocation8 + $0x29]]  ;;  %s1410_s18 = sld [smem:[#allocation7 + $0x2a]] }
  0x79   :  { %v304_v27 = vadd.f32 %v303_v12, %v293_v19  ;;  %v428_v38 = vmul.f32 %v427_v34, %v1041_v0  ;;  %v845_v39 = vpop.eup %844  ;;  %v347_v40 = vmul.f32 %v843_v31, %v346_v25  ;;  %854 = vtanh.f32 %v409_v29  ;;  %s1412_s4 = sld [smem:[#allocation10 + $0x23]] }
  0x7a   :  { %v420_v41 = vadd.f32 %v419_v33, %v417_v32  ;;  %v430_v42 = vstv %s1318_s19  ;;  %v438_v45 = vstv %s1322_s20  ;;  %v441_v46 = vstv %s1324_s21  ;;  %s1416_s19 = sld [smem:[#allocation10 + $0x24]]  ;;  %s1420_s20 = sld [smem:[#allocation8 + $0x2a]] }
  0x7b   :  { %v315_v35 = vadd.f32 %v314_v20, %v304_v27  ;;  %v431_v44 = vadd.f32 %v430_v42, %v428_v38  ;;  %v847_v47 = vpop.eup %846  ;;  %v368_v48 = vstv %s1327_s22  ;;  %v379_v49 = vstv %s1329_s23  ;;  %s1424_s21 = sld [smem:[#allocation7 + $0x2b]]  ;;  %s1427_s22 = sld [smem:[#allocation10 + $0x25]] }
  0x7c   :  { %856 = vtanh.f32 %v420_v41  ;;  %v439_v50 = vmul.f32 %v438_v45, %v1041_v0  ;;  %v358_v52 = vmul.f32 %v845_v39, %v357_v37  ;;  %v449_v53 = vstv %s1333_s24  ;;  %s1429_s23 = sld [smem:[#allocation8 + $0x2b]]  ;;  %s1433_s24 = sld [smem:[#allocation7 + $0x2c]] }
  0x7d   :  { %v326_v43 = vadd.f32 %v325_v28, %v315_v35  ;;  %v452_v54 = vstv %s1335_s25  ;;  %858 = vtanh.f32 %v431_v44  ;;  %v450_v57 = vmul.f32 %v449_v53, %v1041_v0  ;;  %s1435_s25 = sld [smem:[#allocation8 + $0x2c]] }
  0x7e   :  { %v849_v55 = vpop.eup %848  ;;  %v442_v56 = vadd.f32 %v441_v46, %v439_v50  ;;  %v460_v58 = vstv %s1340_s26  ;;  %v369_v60 = vmul.f32 %v847_v47, %v368_v48  ;;  %v463_v62 = vstv %s1343_s27  ;;  %s1440_s26 = sld [smem:[#allocation7 + $0x2d]] }
  0x7f   :  { %v337_v51 = vadd.f32 %v336_v36, %v326_v43  ;;  %v461_v61 = vmul.f32 %v460_v58, %v1041_v0  ;;  %v390_v1 = vstv %s1345_s2  ;;  %v453_v2 = vadd.f32 %v452_v54, %v450_v57  ;;  %s1444_s27 = sld [smem:[#allocation8 + $0x2d]]  ;;  %s1446_s2 = sld [smem:[#allocation10 + $0x26]] }
  0x80   :  { %v851_v63 = vpop.eup %850  ;;  %860 = vtanh.f32 %v442_v56  ;;  %v471_v3 = vstv %s1350_s28  ;;  %v380_v5 = vmul.f32 %v849_v55, %v379_v49  ;;  %v401_v9 = vstv %s1353_s29  ;;  %s1450_s28 = sld [smem:[#allocation7 + $0x2e]]  ;;  %s1452_s29 = sld [smem:[#allocation10 + $0x27]] }
  0x81   :  { %v348_v59 = vadd.f32 %v347_v40, %v337_v51  ;;  %v464_v6 = vadd.f32 %v463_v62, %v461_v61  ;;  %v472_v7 = vmul.f32 %v471_v3, %v1041_v0  ;;  %v853_v8 = vpop.eup %852  ;;  %v412_v10 = vstv %s1356_s30  ;;  %s1457_s30 = sld [smem:[#allocation10 + $0x28]] }
  0x82   :  { %862 = vtanh.f32 %v453_v2  ;;  %v474_v11 = vstv %s1359_s6  ;;  %v391_v13 = vmul.f32 %v851_v63, %v390_v1  ;;  %v482_v15 = vstv %s1363_s7  ;;  %s1460_s6 = sld [smem:[#allocation8 + $0x2e]]  ;;  %s1463_s7 = sld [smem:[#allocation7 + $0x2f]] }
  0x83   :  { %v359_v4 = vadd.f32 %v358_v52, %v348_v59  ;;  %v475_v14 = vadd.f32 %v474_v11, %v472_v7  ;;  %v855_v16 = vpop.eup %854  ;;  %v423_v17 = vstv %s1367_s8  ;;  %864 = vtanh.f32 %v464_v6  ;;  %s1468_s8 = sld [smem:[#allocation8 + $0x2f]] }
  0x84   :  { %v483_v18 = vmul.f32 %v482_v15, %v1041_v0  ;;  %v485_v19 = vstv %s1370_s9  ;;  %v402_v21 = vmul.f32 %v853_v8, %v401_v9  ;;  %v493_v22 = vstv %s1374_s1  ;;  %s1470_s9 = sld [smem:[#allocation7 + $0x30]]  ;;  %s1472_s1 = sld [smem:[#allocation10 + $0x29]] }
  0x85   :  { %v370_v12 = vadd.f32 %v369_v60, %v359_v4  ;;  %v496_v23 = vstv %s1376_s10  ;;  %866 = vtanh.f32 %v475_v14  ;;  %v494_v26 = vmul.f32 %v493_v22, %v1041_v0  ;;  %s1478_s10 = sld [smem:[#allocation8 + $0x30]] }
  0x86   :  { %v857_v24 = vpop.eup %856  ;;  %v486_v25 = vadd.f32 %v485_v19, %v483_v18  ;;  %v504_v27 = vstv %s1380_s11  ;;  %v413_v29 = vmul.f32 %v855_v16, %v412_v10  ;;  %v507_v31 = vstv %s1384_s12  ;;  %s1482_s11 = sld [smem:[#allocation7 + $0x31]] }
  0x87   :  { %v381_v20 = vadd.f32 %v380_v5, %v370_v12  ;;  %v505_v30 = vmul.f32 %v504_v27, %v1041_v0  ;;  %v859_v32 = vpop.eup %858  ;;  %v424_v33 = vmul.f32 %v857_v24, %v423_v17  ;;  %v434_v34 = vstv %s1387_s13  ;;  %s1484_s12 = sld [smem:[#allocation8 + $0x31]]  ;;  %s1487_s13 = sld [smem:[#allocation10 + $0x2a]] }
  0x88   :  { %868 = vtanh.f32 %v486_v25  ;;  %v497_v35 = vadd.f32 %v496_v23, %v494_v26  ;;  %v515_v38 = vstv %s1391_s14  ;;  %v518_v39 = vstv %s1393_s15  ;;  %s1492_s14 = sld [smem:[#allocation10 + $0x2b]]  ;;  %s1496_s15 = sld [smem:[#allocation10 + $0x2c]] }
  0x89   :  { %v392_v28 = vadd.f32 %v391_v13, %v381_v20  ;;  %v508_v37 = vadd.f32 %v507_v31, %v505_v30  ;;  %v445_v41 = vstv %s1397_s16  ;;  %v516_v42 = vmul.f32 %v515_v38, %v1041_v0  ;;  %s1501_s16 = sld [smem:[#allocation10 + $0x2d]] }
  0x8a   :  { %v861_v40 = vpop.eup %860  ;;  %870 = vtanh.f32 %v497_v35  ;;  %v526_v43 = vstv %s1400_s0  ;;  %v435_v45 = vmul.f32 %v859_v32, %v434_v34  ;;  %v456_v46 = vstv %s1402_s3  ;;  %s779_s0 = sld [smem:[#allocation10 + $0x2e]]  ;;  %s782_s3 = sld [smem:[#allocation10 + $0x2f]] }
  0x8b   :  { %v403_v36 = vadd.f32 %v402_v21, %v392_v28  ;;  %v527_v47 = vmul.f32 %v526_v43, %v1041_v0  ;;  %872 = vtanh.f32 %v508_v37  ;;  %v519_v49 = vadd.f32 %v518_v39, %v516_v42 }
  0x8c   :  { %v863_v48 = vpop.eup %862  ;;  %v529_v50 = vstv %s1408_s17  ;;  %v537_v51 = vstv %s1410_s18  ;;  %v446_v53 = vmul.f32 %v861_v40, %v445_v41  ;;  %v467_v57 = vstv %s1412_s4  ;;  %s785_s17 = sld [smem:[#allocation10 + $0x30]]  ;;  %s788_s18 = sld [smem:[#allocation10 + $0x31]] }
  0x8d   :  { %v414_v44 = vadd.f32 %v413_v29, %v403_v36  ;;  %v530_v54 = vadd.f32 %v529_v50, %v527_v47  ;;  %v538_v55 = vmul.f32 %v537_v51, %v1041_v0  ;;  %v865_v56 = vpop.eup %864  ;;  %v478_v58 = vstv %s1416_s19  ;;  %s987_s4 = smov [#allocation11]  }
  0x8e   :  { %874 = vtanh.f32 %v519_v49  ;;  %v540_v59 = vstv %s1420_s20  ;;  %v457_v61 = vmul.f32 %v863_v48, %v456_v46  ;;  %v548_v63 = vstv %s1424_s21  ;;  %s631_s19 = sshll.u32 %s987_s4, 4  ;;  %s632_s19 = int_to_ptr.vmem [resolvable:$true] %s631_s19 }
  0x8f   :  { %v425_v52 = vadd.f32 %v424_v33, %v414_v44  ;;  %v541_v62 = vadd.f32 %v540_v59, %v538_v55  ;;  %v867_v1 = vpop.eup %866  ;;  %v489_v2 = vstv %s1427_s22  ;;  %876 = vtanh.f32 %v530_v54  ;;  %s953_s20 = scalar_lea.vmem %s632_s19, 128  ;;  %p958_p10 = scmp.lt.s32.totalorder %s632_s19, %s632_s19 }
  0x90   :  { %v549_v3 = vmul.f32 %v548_v63, %v1041_v0  ;;  %v551_v4 = vstv %s1429_s23  ;;  %v468_v6 = vmul.f32 %v865_v56, %v467_v57  ;;  %v559_v7 = vstv %s1433_s24  ;;  %p954_p9 = scmp.ne.s32.totalorder %s632_s19, %s953_s20  ;;  %p959_p11 = scmp.lt.s32.totalorder %s953_s20, %s953_s20 }
  0x91   :  { %v436_v60 = vadd.f32 %v435_v45, %v425_v52  ;;  %v562_v8 = vstv %s1435_s25  ;;  %878 = vtanh.f32 %v541_v62  ;;  %v560_v11 = vmul.f32 %v559_v7, %v1041_v0 }
  0x92   :  { %v869_v9 = vpop.eup %868  ;;  %v552_v10 = vadd.f32 %v551_v4, %v549_v3  ;;  %v570_v12 = vstv %s1440_s26  ;;  %v479_v14 = vmul.f32 %v867_v1, %v478_v58  ;;  %v573_v16 = vstv %s1444_s27  ;;  %p960_p12 = por %p959_p11, %p958_p10 }
  0x93   :  { %v447_v5 = vadd.f32 %v446_v53, %v436_v60  ;;  %v571_v15 = vmul.f32 %v570_v12, %v1041_v0  ;;  %v500_v18 = vstv %s1446_s2  ;;  %v563_v19 = vadd.f32 %v562_v8, %v560_v11  ;;  %v894_v0 = vld [vmem:[#allocation3] sm:$0xff] }
  0x94   :  { %v871_v17 = vpop.eup %870  ;;  %880 = vtanh.f32 %v552_v10  ;;  %v581_v20 = vstv %s1450_s28  ;;  %v490_v22 = vmul.f32 %v869_v9, %v489_v2  ;;  %v511_v26 = vstv %s1452_s29  ;;  %p961_p13 = pnand %p960_p12, %p954_p9 }
  0x95   :  { %v458_v13 = vadd.f32 %v457_v61, %v447_v5  ;;  %v574_v23 = vadd.f32 %v573_v16, %v571_v15  ;;  %v582_v24 = vmul.f32 %v894_v0, %v581_v20  ;;  %v873_v25 = vpop.eup %872  ;;  %v522_v27 = vstv %s1457_s30 }
  0x96   :  { %882 = vtanh.f32 %v563_v19  ;;  %v584_v28 = vstv %s1460_s6  ;;  %v501_v30 = vmul.f32 %v871_v17, %v500_v18  ;;  %v592_v32 = vstv %s1463_s7 }
  0x97   :  { %v469_v21 = vadd.f32 %v468_v6, %v458_v13  ;;  %v585_v31 = vadd.f32 %v584_v28, %v582_v24  ;;  %884 = vtanh.f32 %v574_v23  ;;  %v593_v34 = vmul.f32 %v894_v0, %v592_v32 }
  0x98   :  { %v875_v33 = vpop.eup %874  ;;  %v595_v35 = vstv %s1468_s8  ;;  %v603_v36 = vstv %s1470_s9  ;;  %v512_v38 = vmul.f32 %v873_v25, %v511_v26  ;;  %v533_v39 = vstv %s1472_s1 }
  0x99   :  { %v480_v29 = vadd.f32 %v479_v14, %v469_v21  ;;  %v604_v40 = vmul.f32 %v894_v0, %v603_v36  ;;  %v877_v41 = vpop.eup %876  ;;  %v523_v42 = vmul.f32 %v875_v33, %v522_v27  ;;  %886 = vtanh.f32 %v585_v31 }
  0x9a   :  { %v596_v43 = vadd.f32 %v595_v35, %v593_v34  ;;  %v606_v44 = vstv %s1478_s10  ;;  %v614_v47 = vstv %s1482_s11  ;;  %v617_v48 = vstv %s1484_s12 }
  0x9b   :  { %v491_v37 = vadd.f32 %v490_v22, %v480_v29  ;;  %v607_v46 = vadd.f32 %v606_v44, %v604_v40  ;;  %v879_v49 = vpop.eup %878  ;;  %v544_v50 = vstv %s1487_s13  ;;  %v615_v51 = vmul.f32 %v894_v0, %v614_v47 }
  0x9c   :  { %888 = vtanh.f32 %v596_v43  ;;  %v534_v53 = vmul.f32 %v877_v41, %v533_v39  ;;  %v555_v55 = vstv %s1492_s14  ;;  %v545_v58 = vmul.f32 %v879_v49, %v544_v50 }
  0x9d   :  { %v502_v45 = vadd.f32 %v501_v30, %v491_v37  ;;  %890 = vtanh.f32 %v607_v46  ;;  %v618_v56 = vadd.f32 %v617_v48, %v615_v51  ;;  %v566_v60 = vstv %s1496_s15 }
  0x9e   :  { %v881_v54 = vpop.eup %880  ;;  %v577_v1 = vstv %s1501_s16  ;;  %v588_v5 = vstv %s779_s0  ;;  %v599_v9 = vstv %s782_s3  ;;  %v610_v13 = vstv %s785_s17 }
  0x9f   :  { %v513_v52 = vadd.f32 %v512_v38, %v502_v45  ;;  %892 = vtanh.f32 %v618_v56  ;;  %v556_v62 = vmul.f32 %v881_v54, %v555_v55  ;;  %v621_v17 = vstv %s788_s18 }
  0xa0   :  { %v883_v59 = vpop.eup %882 }
  0xa1   :  { %v524_v57 = vadd.f32 %v523_v42, %v513_v52  ;;  %v885_v63 = vpop.eup %884  ;;  %v567_v3 = vmul.f32 %v883_v59, %v566_v60 }
  0xa2   :  { %v578_v7 = vmul.f32 %v885_v63, %v577_v1 }
  0xa3   :  { %v535_v61 = vadd.f32 %v534_v53, %v524_v57  ;;  %v887_v4 = vpop.eup %886 }
  0xa4   :  { %v589_v11 = vmul.f32 %v887_v4, %v588_v5 }
  0xa5   :  { %v546_v2 = vadd.f32 %v545_v58, %v535_v61 }
  0xa6   :  { %v889_v8 = vpop.eup %888 }
  0xa7   :  { %v557_v6 = vadd.f32 %v556_v62, %v546_v2  ;;  %v891_v12 = vpop.eup %890  ;;  %v600_v15 = vmul.f32 %v889_v8, %v599_v9 }
  0xa8   :  { %v611_v19 = vmul.f32 %v891_v12, %v610_v13 }
  0xa9   :  { %v568_v10 = vadd.f32 %v567_v3, %v557_v6  ;;  %v893_v16 = vpop.eup %892 }
  0xaa   :  { %v622_v21 = vmul.f32 %v893_v16, %v621_v17 }
  0xab   :  { %v579_v14 = vadd.f32 %v578_v7, %v568_v10 }
  0xad   :  { %v590_v18 = vadd.f32 %v589_v11, %v579_v14 }
  0xaf   :  { %v601_v20 = vadd.f32 %v600_v15, %v590_v18 }
  0xb1   :  { %v612_v22 = vadd.f32 %v611_v19, %v601_v20 }
  0xb3   :  { %v623_v23 = vadd.f32 %v622_v21, %v612_v22 }
  0xb5   :  { %624 = vst [vmem:[#allocation11] sm:$0xff] %v623_v23 }
  0xb6   :  { %964 = shalt.err (!%p961_p13)
}
  0xb7   :  { %s965_s23 = scalar_lea.hbm %s1527_s5, 128 }
  0xb8   :  { %p966_p0 = scmp.ne.s32.totalorder %s1527_s5, %s965_s23  ;;  %p969_p1 = scmp.lt.u32.totalorder %s965_s23, %s1527_s5 }
  0xba   :  { %p971_p2 = pnand %p969_p1, %p966_p0 }
  0xbc   :  { %974 = shalt.err (!%p971_p2)
}
  0xbd   :  { %634 = dma.vmem_to_hbm [thread:$0]  %s632_s19, 128, %s1527_s5, [#allocation5]  }
  0xbe   :  { %981 = dma.done.wait [#allocation5], 128  }
  0xbf   :  { %982 = vsyncadd [#allocation5], 4294967168 }
  0xc0   :  { %638 = vsyncpa [#allocation4], 1 }
  0xc1   :  { %639 = vsyncpa [#allocation5], 1 }
  0xc2   :  { %640 = vsyncpa [#allocation6], 1 }
  0xc3   :  { %641 = vsyncpa [#allocation9], 1 }

</bundles_post_ra>
